<compile_context>
chip_gen: v5e
topology: v5e:2x2
jax: 0.10.0
libtpu: 0.0.40
codegen_flags: <defaults>
</compile_context>

<pallas_src>
import functools

import jax
import jax.numpy as jnp
from jax import lax
from jax.experimental import pallas as pl
from jax.experimental.pallas import tpu as pltpu


# --------------------------------------------------------------------------- #
# Fused kernel: one grid step == one batch element, end to end.
# --------------------------------------------------------------------------- #
def _dynamic_learner_kernel(x_ref, mask_ref, hm_ref,
                            w1_ref, b1_ref, w2_ref, b2_ref, w3_ref, b3_ref,
                            wq_ref, bq_ref, wk_ref, bk_ref, wv_ref, bv_ref,
                            wo_ref, bo_ref, out_ref, *, num_heads, head_dim):
    f32, bf16 = jnp.float32, jnp.bfloat16

    def fc(h, w_ref, b_ref, relu=True):
        # bf16 operands on the MXU, f32 accumulation; biases stay f32.
        y = jnp.dot(h.astype(bf16), w_ref[...], preferred_element_type=f32) + b_ref[...]
        return jnp.maximum(y, 0.0) if relu else y

    # ---- "nodes" stack: Conv1x1 -> ReLU -> Conv1x1 -> ReLU -> Conv(1, n_hist) ----
    # x is (N, n_hist*n_in); w1/w2 are block-diagonal per-timestep 1x1 convs, so the hidden
    # activations are already laid out as (N, n_hist*D) and the (1, n_hist) conv collapses
    # into ONE K = n_hist*D matmul (no in-kernel reshape, no per-timestep loop).
    x = x_ref[0]
    h = fc(x, w1_ref, b1_ref)                               # (N, n_hist*D)
    h = fc(h, w2_ref, b2_ref)                               # (N, n_hist*D)
    nodes = fc(h, w3_ref, b3_ref, relu=False)               # (N, D)

    # ---- GraphAttention ------------------------------------------------------
    q = fc(nodes, wq_ref, bq_ref)                           # 1/sqrt(8) pre-folded into wq/bq
    k = fc(nodes, wk_ref, bk_ref)
    v = fc(nodes, wv_ref, bv_ref)

    # hm[j, d] == 1 iff key-row j (head j // N) matches channel d (head d // head_dim).
    hm_f32 = hm_ref[...]                                    # (8N, D) f32
    hm_bf16 = hm_f32.astype(bf16)

    # "Block-diagonal" K / V: every head handled by full-width, lane-dense matmuls.
    k_bd = jnp.tile(k.astype(bf16), (num_heads, 1)) * hm_bf16        # (8N, D)
    v_bd = jnp.tile(v.astype(bf16), (num_heads, 1)) * hm_bf16        # (8N, D)

    # All-head scores in one (N, 8N) matmul (8N == 128 lanes at N == 16).
    s = lax.dot_general(q.astype(bf16), k_bd, (((1,), (1,)), ((), ())),
                        preferred_element_type=f32)                  # (N, 8N)
    # Shift by the global row max: softmax is shift-invariant, so this equals the per-head
    # shift (same math) while avoiding a per-head lane-segment max.
    e = jnp.exp(s - jnp.max(s, axis=-1, keepdims=True))              # (N, 8N) f32

    ctx = jnp.dot(e.astype(bf16), v_bd, preferred_element_type=f32)  # (N, D) un-normalized
    denom = jnp.dot(e, hm_f32, preferred_element_type=f32)           # per-head sums -> (N, D)
    attn = ctx * pl.reciprocal(denom, approx=True)                   # softmax normalization
    matrix = fc(attn, wo_ref, bo_ref)                                # output FC (BN folded)

    # self.dropout(matrix): result discarded in the reference forward -> no-op.

    # ---- adjacency: gram * mask, row-wise L2 normalization --------------------
    mb = matrix.astype(bf16)
    a = lax.dot_general(mb, mb, (((1,), (1,)), ((), ())),
                        preferred_element_type=f32)                  # (N, N)
    a = a * mask_ref[0]
    ss = jnp.sum(a * a, axis=-1, keepdims=True)
    # F.normalize(p=2, dim=-1, eps=1e-12): x / max(||x||, eps) == x * rsqrt(max(||x||^2, eps^2))
    out_ref[0] = a * lax.rsqrt(jnp.maximum(ss, 1e-24))


# --------------------------------------------------------------------------- #
# Parameters (deterministic, synthetic) -- prepared in the fused-kernel layout.
# --------------------------------------------------------------------------- #
def make_params(key, n_in, node_dim, n_hist):
    D, T = node_dim, n_hist
    keys = jax.random.split(key, 7)

    def xavier(k, shape):
        fan_in, fan_out = shape[-2], shape[-1]
        lim = (6.0 / (fan_in + fan_out)) ** 0.5
        return jax.random.uniform(k, shape, jnp.float32, -lim, lim)

    w1 = xavier(keys[0], (n_in, D))
    w2 = xavier(keys[1], (D, D))
    w3 = xavier(keys[2], (T, D, D))                     # w3[t, c_in, c_out]
    b1 = jnp.zeros((D,), jnp.float32)
    b2 = jnp.zeros((D,), jnp.float32)
    b3 = jnp.zeros((D,), jnp.float32)

    eye_t = jnp.eye(T, dtype=jnp.float32)
    params = {
        # Block-diagonal per-timestep 1x1 convs (so the kernel needs no reshape/relayout).
        'w1': jnp.kron(eye_t, w1).astype(jnp.bfloat16),   # (T*n_in, T*D)
        'b1': jnp.tile(b1[None, :], (1, T)),              # (1, T*D) f32
        'w2': jnp.kron(eye_t, w2).astype(jnp.bfloat16),   # (T*D, T*D)
        'b2': jnp.tile(b2[None, :], (1, T)),              # (1, T*D)
        # Conv(1, n_hist) == single K = T*D contraction.
        'w3': w3.reshape(T * D, D).astype(jnp.bfloat16),  # (T*D, D)
        'b3': b3[None, :],                                # (1, D)
    }

    # GraphAttention FCs: eval-mode BatchNorm2d (mean=0, var=1, gamma=1, beta=0) folded into
    # weight & bias; the 1/sqrt(d) = 1/sqrt(8) attention scale is folded into the q projection
    # (valid through the ReLU because the scale is positive).
    bn_scale = 1.0 / (1.0 + 1e-5) ** 0.5
    attn_scale = 1.0 / (8.0 ** 0.5)
    for name, k, extra in (('q', keys[3], attn_scale), ('k', keys[4], 1.0),
                           ('v', keys[5], 1.0), ('o', keys[6], 1.0)):
        scale = bn_scale * extra
        params[f'w{name}'] = (xavier(k, (D, D)) * scale).astype(jnp.bfloat16)
        params[f'b{name}'] = jnp.zeros((1, D), jnp.float32) * scale   # zero-init bias
    return params


# --------------------------------------------------------------------------- #
# Host-side wrapper.
# --------------------------------------------------------------------------- #
def dynamic_learner_forward(inputs, mask, params, node_dim):
    B, T, N, Cin = inputs.shape
    D = node_dim
    num_heads = 8
    head_dim = D // num_heads
    HN = num_heads * N

    # Channels-last slab per batch element: x[b, n, t*Cin + c] = inputs[b, t, n, c].
    x = jnp.transpose(inputs, (0, 2, 1, 3)).reshape(B, N, T * Cin)

    # Head-selector mask: hm[j, d] = (j // N == d // head_dim).  Constant, built host-side.
    head_mask = (jnp.arange(HN)[:, None] // N ==
                 jnp.arange(D)[None, :] // head_dim).astype(jnp.float32)

    def full_spec(arr):
        nd = arr.ndim
        return pl.BlockSpec(arr.shape, lambda b, _nd=nd: (0,) * _nd)

    def per_batch(shape):
        return pl.BlockSpec((1,) + shape, lambda b: (b, 0, 0))

    weight_args = (params['w1'], params['b1'], params['w2'], params['b2'],
                   params['w3'], params['b3'],
                   params['wq'], params['bq'], params['wk'], params['bk'],
                   params['wv'], params['bv'], params['wo'], params['bo'])

    kernel = functools.partial(_dynamic_learner_kernel,
                               num_heads=num_heads, head_dim=head_dim)

    return pl.pallas_call(
        kernel,
        out_shape=jax.ShapeDtypeStruct((B, N, N), jnp.float32),
        grid=(B,),
        in_specs=[per_batch((N, T * Cin)),            # x
                  per_batch((N, N)),                  # mask
                  full_spec(head_mask)]               # head selector
                 + [full_spec(w) for w in weight_args],
        out_specs=per_batch((N, N)),
        # Batch axis parallel: v7x's two TensorCores each take half of B; no-op on v5e/v6e.
        compiler_params=pltpu.CompilerParams(dimension_semantics=("parallel",)),
    )(x, mask, head_mask, *weight_args)


if __name__ == "__main__":
    B, n_hist, N, n_in, node_dim = 2, 8, 16, 4, 32          # node_dim % 8 == 0

    key = jax.random.PRNGKey(0)
    k_in, k_mask, k_param = jax.random.split(key, 3)

    inputs = jax.random.normal(k_in, (B, n_hist, N, n_in), jnp.float32)
    mask = (jax.random.uniform(k_mask, (B, N, N)) > 0.2).astype(jnp.float32)
    params = make_params(k_param, n_in, node_dim, n_hist)

    out = dynamic_learner_forward(inputs, mask, params, node_dim)
    out = jax.block_until_ready(out)
    assert out.shape == (B, N, N) and out.dtype == jnp.float32
    assert bool(jnp.all(jnp.isfinite(out)))
    print("KERNEL_OK")
</pallas_src>

<mosaic_0001>
module attributes {stable_mosaic.version = 11 : i64} {
  func.func @_dynamic_learner_kernel(%arg0: i32, %arg1: memref<1x16x32xf32, #tpu.memory_space<vmem>>, %arg2: memref<1x16x16xf32, #tpu.memory_space<vmem>>, %arg3: memref<128x32xf32, #tpu.memory_space<vmem>>, %arg4: memref<32x256xbf16, #tpu.memory_space<vmem>>, %arg5: memref<1x256xf32, #tpu.memory_space<vmem>>, %arg6: memref<256x256xbf16, #tpu.memory_space<vmem>>, %arg7: memref<1x256xf32, #tpu.memory_space<vmem>>, %arg8: memref<256x32xbf16, #tpu.memory_space<vmem>>, %arg9: memref<1x32xf32, #tpu.memory_space<vmem>>, %arg10: memref<32x32xbf16, #tpu.memory_space<vmem>>, %arg11: memref<1x32xf32, #tpu.memory_space<vmem>>, %arg12: memref<32x32xbf16, #tpu.memory_space<vmem>>, %arg13: memref<1x32xf32, #tpu.memory_space<vmem>>, %arg14: memref<32x32xbf16, #tpu.memory_space<vmem>>, %arg15: memref<1x32xf32, #tpu.memory_space<vmem>>, %arg16: memref<32x32xbf16, #tpu.memory_space<vmem>>, %arg17: memref<1x32xf32, #tpu.memory_space<vmem>>, %arg18: memref<1x16x16xf32, #tpu.memory_space<vmem>>) attributes {dimension_semantics = [#tpu.dimension_semantics<parallel>], iteration_bounds = array<i64: 2>, scalar_prefetch = 0 : i64, scratch_operands = 0 : i64, tpu.core_type = #tpu.core_type<tc>, window_params = [{transform_indices = @transform_0, window_bounds = array<i64: 1, 16, 32>}, {transform_indices = @transform_1, window_bounds = array<i64: 1, 16, 16>}, {pipeline_mode = #tpu.pipeline_mode<synchronous>, transform_indices = @transform_2, window_bounds = array<i64: 128, 32>}, {pipeline_mode = #tpu.pipeline_mode<synchronous>, transform_indices = @transform_3, window_bounds = array<i64: 32, 256>}, {pipeline_mode = #tpu.pipeline_mode<synchronous>, transform_indices = @transform_4, window_bounds = array<i64: 1, 256>}, {pipeline_mode = #tpu.pipeline_mode<synchronous>, transform_indices = @transform_5, window_bounds = array<i64: 256, 256>}, {pipeline_mode = #tpu.pipeline_mode<synchronous>, transform_indices = @transform_6, window_bounds = array<i64: 1, 256>}, {pipeline_mode = #tpu.pipeline_mode<synchronous>, transform_indices = @transform_7, window_bounds = array<i64: 256, 32>}, {pipeline_mode = #tpu.pipeline_mode<synchronous>, transform_indices = @transform_8, window_bounds = array<i64: 1, 32>}, {pipeline_mode = #tpu.pipeline_mode<synchronous>, transform_indices = @transform_9, window_bounds = array<i64: 32, 32>}, {pipeline_mode = #tpu.pipeline_mode<synchronous>, transform_indices = @transform_10, window_bounds = array<i64: 1, 32>}, {pipeline_mode = #tpu.pipeline_mode<synchronous>, transform_indices = @transform_11, window_bounds = array<i64: 32, 32>}, {pipeline_mode = #tpu.pipeline_mode<synchronous>, transform_indices = @transform_12, window_bounds = array<i64: 1, 32>}, {pipeline_mode = #tpu.pipeline_mode<synchronous>, transform_indices = @transform_13, window_bounds = array<i64: 32, 32>}, {pipeline_mode = #tpu.pipeline_mode<synchronous>, transform_indices = @transform_14, window_bounds = array<i64: 1, 32>}, {pipeline_mode = #tpu.pipeline_mode<synchronous>, transform_indices = @transform_15, window_bounds = array<i64: 32, 32>}, {pipeline_mode = #tpu.pipeline_mode<synchronous>, transform_indices = @transform_16, window_bounds = array<i64: 1, 32>}, {transform_indices = @transform_17, window_bounds = array<i64: 1, 16, 16>}]} {
    %c0 = arith.constant 0 : index
    %c0_0 = arith.constant 0 : index
    %c0_1 = arith.constant 0 : index
    %0 = vector.load %arg1[%c0, %c0_0, %c0_1] : memref<1x16x32xf32, #tpu.memory_space<vmem>>, vector<1x16x32xf32>
    %1 = vector.shape_cast %0 : vector<1x16x32xf32> to vector<16x32xf32>
    %2 = arith.truncf %1 : vector<16x32xf32> to vector<16x32xbf16>
    %c0_2 = arith.constant 0 : index
    %c0_3 = arith.constant 0 : index
    %3 = vector.load %arg4[%c0_2, %c0_3] : memref<32x256xbf16, #tpu.memory_space<vmem>>, vector<32x256xbf16>
    %cst = arith.constant dense<0.000000e+00> : vector<16x256xf32>
    %4 = tpu.matmul %2, %3, %cst {dimension_numbers = #tpu.dot_dimension_numbers<[1], [0], [0], [1], [0, 0, 1, 1], [], []>} : vector<16x32xbf16>, vector<32x256xbf16>, vector<16x256xf32> -> vector<16x256xf32>
    %c0_4 = arith.constant 0 : index
    %c0_5 = arith.constant 0 : index
    %5 = vector.load %arg5[%c0_4, %c0_5] : memref<1x256xf32, #tpu.memory_space<vmem>>, vector<1x256xf32>
    %6 = vector.broadcast %5 : vector<1x256xf32> to vector<16x256xf32>
    %7 = arith.addf %4, %6 : vector<16x256xf32>
    %cst_6 = arith.constant 0.000000e+00 : f32
    %8 = vector.broadcast %cst_6 : f32 to vector<16x256xf32>
    %9 = arith.maximumf %7, %8 : vector<16x256xf32>
    %10 = arith.truncf %9 : vector<16x256xf32> to vector<16x256xbf16>
    %c0_7 = arith.constant 0 : index
    %c0_8 = arith.constant 0 : index
    %11 = vector.load %arg6[%c0_7, %c0_8] : memref<256x256xbf16, #tpu.memory_space<vmem>>, vector<256x256xbf16>
    %cst_9 = arith.constant dense<0.000000e+00> : vector<16x256xf32>
    %12 = tpu.matmul %10, %11, %cst_9 {dimension_numbers = #tpu.dot_dimension_numbers<[1], [0], [0], [1], [0, 0, 1, 1], [], []>} : vector<16x256xbf16>, vector<256x256xbf16>, vector<16x256xf32> -> vector<16x256xf32>
    %c0_10 = arith.constant 0 : index
    %c0_11 = arith.constant 0 : index
    %13 = vector.load %arg7[%c0_10, %c0_11] : memref<1x256xf32, #tpu.memory_space<vmem>>, vector<1x256xf32>
    %14 = vector.broadcast %13 : vector<1x256xf32> to vector<16x256xf32>
    %15 = arith.addf %12, %14 : vector<16x256xf32>
    %cst_12 = arith.constant 0.000000e+00 : f32
    %16 = vector.broadcast %cst_12 : f32 to vector<16x256xf32>
    %17 = arith.maximumf %15, %16 : vector<16x256xf32>
    %18 = arith.truncf %17 : vector<16x256xf32> to vector<16x256xbf16>
    %c0_13 = arith.constant 0 : index
    %c0_14 = arith.constant 0 : index
    %19 = vector.load %arg8[%c0_13, %c0_14] : memref<256x32xbf16, #tpu.memory_space<vmem>>, vector<256x32xbf16>
    %cst_15 = arith.constant dense<0.000000e+00> : vector<16x32xf32>
    %20 = tpu.matmul %18, %19, %cst_15 {dimension_numbers = #tpu.dot_dimension_numbers<[1], [0], [0], [1], [0, 0, 1, 1], [], []>} : vector<16x256xbf16>, vector<256x32xbf16>, vector<16x32xf32> -> vector<16x32xf32>
    %c0_16 = arith.constant 0 : index
    %c0_17 = arith.constant 0 : index
    %21 = vector.load %arg9[%c0_16, %c0_17] : memref<1x32xf32, #tpu.memory_space<vmem>>, vector<1x32xf32>
    %22 = vector.broadcast %21 : vector<1x32xf32> to vector<16x32xf32>
    %23 = arith.addf %20, %22 : vector<16x32xf32>
    %24 = arith.truncf %23 : vector<16x32xf32> to vector<16x32xbf16>
    %c0_18 = arith.constant 0 : index
    %c0_19 = arith.constant 0 : index
    %25 = vector.load %arg10[%c0_18, %c0_19] : memref<32x32xbf16, #tpu.memory_space<vmem>>, vector<32x32xbf16>
    %cst_20 = arith.constant dense<0.000000e+00> : vector<16x32xf32>
    %26 = tpu.matmul %24, %25, %cst_20 {dimension_numbers = #tpu.dot_dimension_numbers<[1], [0], [0], [1], [0, 0, 1, 1], [], []>} : vector<16x32xbf16>, vector<32x32xbf16>, vector<16x32xf32> -> vector<16x32xf32>
    %c0_21 = arith.constant 0 : index
    %c0_22 = arith.constant 0 : index
    %27 = vector.load %arg11[%c0_21, %c0_22] : memref<1x32xf32, #tpu.memory_space<vmem>>, vector<1x32xf32>
    %28 = vector.broadcast %27 : vector<1x32xf32> to vector<16x32xf32>
    %29 = arith.addf %26, %28 : vector<16x32xf32>
    %cst_23 = arith.constant 0.000000e+00 : f32
    %30 = vector.broadcast %cst_23 : f32 to vector<16x32xf32>
    %31 = arith.maximumf %29, %30 : vector<16x32xf32>
    %32 = arith.truncf %23 : vector<16x32xf32> to vector<16x32xbf16>
    %c0_24 = arith.constant 0 : index
    %c0_25 = arith.constant 0 : index
    %33 = vector.load %arg12[%c0_24, %c0_25] : memref<32x32xbf16, #tpu.memory_space<vmem>>, vector<32x32xbf16>
    %cst_26 = arith.constant dense<0.000000e+00> : vector<16x32xf32>
    %34 = tpu.matmul %32, %33, %cst_26 {dimension_numbers = #tpu.dot_dimension_numbers<[1], [0], [0], [1], [0, 0, 1, 1], [], []>} : vector<16x32xbf16>, vector<32x32xbf16>, vector<16x32xf32> -> vector<16x32xf32>
    %c0_27 = arith.constant 0 : index
    %c0_28 = arith.constant 0 : index
    %35 = vector.load %arg13[%c0_27, %c0_28] : memref<1x32xf32, #tpu.memory_space<vmem>>, vector<1x32xf32>
    %36 = vector.broadcast %35 : vector<1x32xf32> to vector<16x32xf32>
    %37 = arith.addf %34, %36 : vector<16x32xf32>
    %cst_29 = arith.constant 0.000000e+00 : f32
    %38 = vector.broadcast %cst_29 : f32 to vector<16x32xf32>
    %39 = arith.maximumf %37, %38 : vector<16x32xf32>
    %40 = arith.truncf %23 : vector<16x32xf32> to vector<16x32xbf16>
    %c0_30 = arith.constant 0 : index
    %c0_31 = arith.constant 0 : index
    %41 = vector.load %arg14[%c0_30, %c0_31] : memref<32x32xbf16, #tpu.memory_space<vmem>>, vector<32x32xbf16>
    %cst_32 = arith.constant dense<0.000000e+00> : vector<16x32xf32>
    %42 = tpu.matmul %40, %41, %cst_32 {dimension_numbers = #tpu.dot_dimension_numbers<[1], [0], [0], [1], [0, 0, 1, 1], [], []>} : vector<16x32xbf16>, vector<32x32xbf16>, vector<16x32xf32> -> vector<16x32xf32>
    %c0_33 = arith.constant 0 : index
    %c0_34 = arith.constant 0 : index
    %43 = vector.load %arg15[%c0_33, %c0_34] : memref<1x32xf32, #tpu.memory_space<vmem>>, vector<1x32xf32>
    %44 = vector.broadcast %43 : vector<1x32xf32> to vector<16x32xf32>
    %45 = arith.addf %42, %44 : vector<16x32xf32>
    %cst_35 = arith.constant 0.000000e+00 : f32
    %46 = vector.broadcast %cst_35 : f32 to vector<16x32xf32>
    %47 = arith.maximumf %45, %46 : vector<16x32xf32>
    %c0_36 = arith.constant 0 : index
    %c0_37 = arith.constant 0 : index
    %48 = vector.load %arg3[%c0_36, %c0_37] : memref<128x32xf32, #tpu.memory_space<vmem>>, vector<128x32xf32>
    %49 = arith.truncf %48 : vector<128x32xf32> to vector<128x32xbf16>
    %50 = arith.truncf %39 : vector<16x32xf32> to vector<16x32xbf16>
    %51 = tpu.concatenate %50, %50, %50, %50, %50, %50, %50, %50 in 0 : vector<16x32xbf16>, vector<16x32xbf16>, vector<16x32xbf16>, vector<16x32xbf16>, vector<16x32xbf16>, vector<16x32xbf16>, vector<16x32xbf16>, vector<16x32xbf16> -> vector<128x32xbf16>
    %52 = arith.mulf %51, %49 : vector<128x32xbf16>
    %53 = arith.truncf %47 : vector<16x32xf32> to vector<16x32xbf16>
    %54 = tpu.concatenate %53, %53, %53, %53, %53, %53, %53, %53 in 0 : vector<16x32xbf16>, vector<16x32xbf16>, vector<16x32xbf16>, vector<16x32xbf16>, vector<16x32xbf16>, vector<16x32xbf16>, vector<16x32xbf16>, vector<16x32xbf16> -> vector<128x32xbf16>
    %55 = arith.mulf %54, %49 : vector<128x32xbf16>
    %56 = arith.truncf %31 : vector<16x32xf32> to vector<16x32xbf16>
    %cst_38 = arith.constant dense<0.000000e+00> : vector<16x128xf32>
    %57 = tpu.matmul %56, %52, %cst_38 {dimension_numbers = #tpu.dot_dimension_numbers<[1], [1], [0], [0], [0, 0, 1, 0], [], []>} : vector<16x32xbf16>, vector<128x32xbf16>, vector<16x128xf32> -> vector<16x128xf32>
    %cst_39 = arith.constant dense<0xFF800000> : vector<16xf32>
    %58 = vector.multi_reduction <maximumf>, %57, %cst_39 [1] : vector<16x128xf32> to vector<16xf32>
    %59 = vector.shape_cast %58 : vector<16xf32> to vector<16x1xf32>
    %60 = vector.broadcast %59 : vector<16x1xf32> to vector<16x128xf32>
    %61 = arith.subf %57, %60 : vector<16x128xf32>
    %62 = math.exp %61 : vector<16x128xf32>
    %63 = arith.truncf %62 : vector<16x128xf32> to vector<16x128xbf16>
    %cst_40 = arith.constant dense<0.000000e+00> : vector<16x32xf32>
    %64 = tpu.matmul %63, %55, %cst_40 {dimension_numbers = #tpu.dot_dimension_numbers<[1], [0], [0], [1], [0, 0, 1, 1], [], []>} : vector<16x128xbf16>, vector<128x32xbf16>, vector<16x32xf32> -> vector<16x32xf32>
    %cst_41 = arith.constant dense<0.000000e+00> : vector<16x32xf32>
    %65 = tpu.matmul %62, %48, %cst_41 {dimension_numbers = #tpu.dot_dimension_numbers<[1], [0], [0], [1], [0, 0, 1, 1], [], []>} : vector<16x128xf32>, vector<128x32xf32>, vector<16x32xf32> -> vector<16x32xf32>
    %66 = tpu.reciprocal %65 {approx = true} : vector<16x32xf32> -> vector<16x32xf32>
    %67 = arith.mulf %64, %66 : vector<16x32xf32>
    %68 = arith.truncf %67 : vector<16x32xf32> to vector<16x32xbf16>
    %c0_42 = arith.constant 0 : index
    %c0_43 = arith.constant 0 : index
    %69 = vector.load %arg16[%c0_42, %c0_43] : memref<32x32xbf16, #tpu.memory_space<vmem>>, vector<32x32xbf16>
    %cst_44 = arith.constant dense<0.000000e+00> : vector<16x32xf32>
    %70 = tpu.matmul %68, %69, %cst_44 {dimension_numbers = #tpu.dot_dimension_numbers<[1], [0], [0], [1], [0, 0, 1, 1], [], []>} : vector<16x32xbf16>, vector<32x32xbf16>, vector<16x32xf32> -> vector<16x32xf32>
    %c0_45 = arith.constant 0 : index
    %c0_46 = arith.constant 0 : index
    %71 = vector.load %arg17[%c0_45, %c0_46] : memref<1x32xf32, #tpu.memory_space<vmem>>, vector<1x32xf32>
    %72 = vector.broadcast %71 : vector<1x32xf32> to vector<16x32xf32>
    %73 = arith.addf %70, %72 : vector<16x32xf32>
    %cst_47 = arith.constant 0.000000e+00 : f32
    %74 = vector.broadcast %cst_47 : f32 to vector<16x32xf32>
    %75 = arith.maximumf %73, %74 : vector<16x32xf32>
    %76 = arith.truncf %75 : vector<16x32xf32> to vector<16x32xbf16>
    %cst_48 = arith.constant dense<0.000000e+00> : vector<16x16xf32>
    %77 = tpu.matmul %76, %76, %cst_48 {dimension_numbers = #tpu.dot_dimension_numbers<[1], [1], [0], [0], [0, 0, 1, 0], [], []>} : vector<16x32xbf16>, vector<16x32xbf16>, vector<16x16xf32> -> vector<16x16xf32>
    %c0_49 = arith.constant 0 : index
    %c0_50 = arith.constant 0 : index
    %c0_51 = arith.constant 0 : index
    %78 = vector.load %arg2[%c0_49, %c0_50, %c0_51] : memref<1x16x16xf32, #tpu.memory_space<vmem>>, vector<1x16x16xf32>
    %79 = vector.shape_cast %78 : vector<1x16x16xf32> to vector<16x16xf32>
    %80 = arith.mulf %77, %79 : vector<16x16xf32>
    %81 = arith.mulf %80, %80 : vector<16x16xf32>
    %cst_52 = arith.constant dense<0.000000e+00> : vector<16xf32>
    %82 = vector.multi_reduction <add>, %81, %cst_52 [1] : vector<16x16xf32> to vector<16xf32>
    %83 = vector.shape_cast %82 : vector<16xf32> to vector<16x1xf32>
    %cst_53 = arith.constant 1.000000e-24 : f32
    %84 = vector.broadcast %cst_53 : f32 to vector<16x1xf32>
    %85 = arith.maximumf %83, %84 : vector<16x1xf32>
    %86 = math.rsqrt %85 : vector<16x1xf32>
    %87 = vector.broadcast %86 : vector<16x1xf32> to vector<16x16xf32>
    %88 = arith.mulf %80, %87 : vector<16x16xf32>
    %c0_54 = arith.constant 0 : index
    %c0_55 = arith.constant 0 : index
    %c0_56 = arith.constant 0 : index
    %89 = vector.load %arg18[%c0_54, %c0_55, %c0_56] : memref<1x16x16xf32, #tpu.memory_space<vmem>>, vector<1x16x16xf32>
    %90 = vector.shape_cast %89 : vector<1x16x16xf32> to vector<16x16xf32>
    %91 = vector.shape_cast %88 : vector<16x16xf32> to vector<1x16x16xf32>
    tpu.vector_store %arg18[%c0_54, %c0_55, %c0_56], %91 {strides = array<i32>} : memref<1x16x16xf32, #tpu.memory_space<vmem>>, vector<1x16x16xf32>,
    return
  }
  func.func @transform_0(%arg0: i32) -> (i32, i32, i32) {
    %c0_i32 = arith.constant 0 : i32
    %c0_i32_0 = arith.constant 0 : i32
    %c0_i32_1 = arith.constant 0 : i32
    return %arg0, %c0_i32, %c0_i32_0 : i32, i32, i32
  }
  func.func @transform_1(%arg0: i32) -> (i32, i32, i32) {
    %c0_i32 = arith.constant 0 : i32
    %c0_i32_0 = arith.constant 0 : i32
    %c0_i32_1 = arith.constant 0 : i32
    return %arg0, %c0_i32, %c0_i32_0 : i32, i32, i32
  }
  func.func @transform_2(%arg0: i32) -> (i32, i32) {
    %c0_i32 = arith.constant 0 : i32
    %c0_i32_0 = arith.constant 0 : i32
    %c0_i32_1 = arith.constant 0 : i32
    return %c0_i32, %c0_i32_0 : i32, i32
  }
  func.func @transform_3(%arg0: i32) -> (i32, i32) {
    %c0_i32 = arith.constant 0 : i32
    %c0_i32_0 = arith.constant 0 : i32
    %c0_i32_1 = arith.constant 0 : i32
    return %c0_i32, %c0_i32_0 : i32, i32
  }
  func.func @transform_4(%arg0: i32) -> (i32, i32) {
    %c0_i32 = arith.constant 0 : i32
    %c0_i32_0 = arith.constant 0 : i32
    %c0_i32_1 = arith.constant 0 : i32
    return %c0_i32, %c0_i32_0 : i32, i32
  }
  func.func @transform_5(%arg0: i32) -> (i32, i32) {
    %c0_i32 = arith.constant 0 : i32
    %c0_i32_0 = arith.constant 0 : i32
    %c0_i32_1 = arith.constant 0 : i32
    return %c0_i32, %c0_i32_0 : i32, i32
  }
  func.func @transform_6(%arg0: i32) -> (i32, i32) {
    %c0_i32 = arith.constant 0 : i32
    %c0_i32_0 = arith.constant 0 : i32
    %c0_i32_1 = arith.constant 0 : i32
    return %c0_i32, %c0_i32_0 : i32, i32
  }
  func.func @transform_7(%arg0: i32) -> (i32, i32) {
    %c0_i32 = arith.constant 0 : i32
    %c0_i32_0 = arith.constant 0 : i32
    %c0_i32_1 = arith.constant 0 : i32
    return %c0_i32, %c0_i32_0 : i32, i32
  }
  func.func @transform_8(%arg0: i32) -> (i32, i32) {
    %c0_i32 = arith.constant 0 : i32
    %c0_i32_0 = arith.constant 0 : i32
    %c0_i32_1 = arith.constant 0 : i32
    return %c0_i32, %c0_i32_0 : i32, i32
  }
  func.func @transform_9(%arg0: i32) -> (i32, i32) {
    %c0_i32 = arith.constant 0 : i32
    %c0_i32_0 = arith.constant 0 : i32
    %c0_i32_1 = arith.constant 0 : i32
    return %c0_i32, %c0_i32_0 : i32, i32
  }
  func.func @transform_10(%arg0: i32) -> (i32, i32) {
    %c0_i32 = arith.constant 0 : i32
    %c0_i32_0 = arith.constant 0 : i32
    %c0_i32_1 = arith.constant 0 : i32
    return %c0_i32, %c0_i32_0 : i32, i32
  }
  func.func @transform_11(%arg0: i32) -> (i32, i32) {
    %c0_i32 = arith.constant 0 : i32
    %c0_i32_0 = arith.constant 0 : i32
    %c0_i32_1 = arith.constant 0 : i32
    return %c0_i32, %c0_i32_0 : i32, i32
  }
  func.func @transform_12(%arg0: i32) -> (i32, i32) {
    %c0_i32 = arith.constant 0 : i32
    %c0_i32_0 = arith.constant 0 : i32
    %c0_i32_1 = arith.constant 0 : i32
    return %c0_i32, %c0_i32_0 : i32, i32
  }
  func.func @transform_13(%arg0: i32) -> (i32, i32) {
    %c0_i32 = arith.constant 0 : i32
    %c0_i32_0 = arith.constant 0 : i32
    %c0_i32_1 = arith.constant 0 : i32
    return %c0_i32, %c0_i32_0 : i32, i32
  }
  func.func @transform_14(%arg0: i32) -> (i32, i32) {
    %c0_i32 = arith.constant 0 : i32
    %c0_i32_0 = arith.constant 0 : i32
    %c0_i32_1 = arith.constant 0 : i32
    return %c0_i32, %c0_i32_0 : i32, i32
  }
  func.func @transform_15(%arg0: i32) -> (i32, i32) {
    %c0_i32 = arith.constant 0 : i32
    %c0_i32_0 = arith.constant 0 : i32
    %c0_i32_1 = arith.constant 0 : i32
    return %c0_i32, %c0_i32_0 : i32, i32
  }
  func.func @transform_16(%arg0: i32) -> (i32, i32) {
    %c0_i32 = arith.constant 0 : i32
    %c0_i32_0 = arith.constant 0 : i32
    %c0_i32_1 = arith.constant 0 : i32
    return %c0_i32, %c0_i32_0 : i32, i32
  }
  func.func @transform_17(%arg0: i32) -> (i32, i32, i32) {
    %c0_i32 = arith.constant 0 : i32
    %c0_i32_0 = arith.constant 0 : i32
    %c0_i32_1 = arith.constant 0 : i32
    return %arg0, %c0_i32, %c0_i32_0 : i32, i32, i32
  }
}

</mosaic_0001>

<bundles_post_ra>
// kernel: tpu_custom_call.1
= control target key start
LH: loop header
LB: loop body
LE: loop exit
PB: predicated region body
PF: predicated region fallthrough
CT: control target
= control target key end

     0   :  { %s3246_s0 = inlined_call_operand.vmem [shape: f32[2,16,32], index: 0, kind: input, shape index: {}]   ;;  %s3247_s1 = inlined_call_operand.hbm [shape: f32[2,16,16], index: 1, kind: input, shape index: {}]   ;;  %s3248_s2 = inlined_call_operand.vmem [shape: f32[128,32], index: 2, kind: input, shape index: {}]   ;;  %s3249_s3 = inlined_call_operand.hbm [shape: bf16[32,256], index: 3, kind: input, shape index: {}]   ;;  %s3250_s4 = inlined_call_operand.vmem [shape: f32[1,256], index: 4, kind: input, shape index: {}]   ;;  %s3251_s5 = inlined_call_operand.vmem [shape: bf16[256,256], index: 5, kind: input, shape index: {}]   ;;  %s3252_s6 = inlined_call_operand.hbm [shape: f32[1,256], index: 6, kind: input, shape index: {}]   ;;  %s3253_s7 = inlined_call_operand.vmem [shape: bf16[256,32], index: 7, kind: input, shape index: {}]   ;;  %s3254_s8 = inlined_call_operand.vmem [shape: f32[1,32], index: 8, kind: input, shape index: {}]   ;;  %s3255_s9 = inlined_call_operand.hbm [shape: bf16[32,32], index: 9, kind: input, shape index: {}]   ;;  %s3256_s10 = inlined_call_operand.vmem [shape: f32[1,32], index: 10, kind: input, shape index: {}]   ;;  %s3257_s11 = inlined_call_operand.hbm [shape: bf16[32,32], index: 11, kind: input, shape index: {}]   ;;  %s3258_s12 = inlined_call_operand.vmem [shape: f32[1,32], index: 12, kind: input, shape index: {}]   ;;  %s3259_s13 = inlined_call_operand.hbm [shape: bf16[32,32], index: 13, kind: input, shape index: {}]   ;;  %s3260_s14 = inlined_call_operand.vmem [shape: f32[1,32], index: 14, kind: input, shape index: {}]   ;;  %s3261_s15 = inlined_call_operand.hbm [shape: bf16[32,32], index: 15, kind: input, shape index: {}]   ;;  %s3262_s16 = inlined_call_operand.vmem [shape: f32[1,32], index: 16, kind: input, shape index: {}]   ;;  %s3263_s17 = inlined_call_operand.hbm [shape: f32[2,16,16], index: 17, kind: output, shape index: {}]  }
   0x1   :  { %3269 = sst [smem:[#allocation20_spill]] %s3246_s0 }
   0x2   :  { %3270 = sst [smem:[#allocation21_spill]] %s3247_s1 }
   0x3   :  { %3271 = sst [smem:[#allocation22_spill]] %s3248_s2 }
   0x4   :  { %3272 = sst [smem:[#allocation23_spill]] %s3249_s3 }
   0x5   :  { %3273 = sst [smem:[#allocation24_spill]] %s3252_s6 }
   0x6   :  { %3274 = sst [smem:[#allocation25_spill]] %s3255_s9 }
   0x7   :  { %3275 = sst [smem:[#allocation26_spill]] %s3256_s10 }
   0x8   :  { %3276 = sst [smem:[#allocation27_spill]] %s3257_s11 }
   0x9   :  { %3277 = sst [smem:[#allocation28_spill]] %s3258_s12 }
   0xa   :  { %3278 = sst [smem:[#allocation29_spill]] %s3259_s13 }
   0xb   :  { %3279 = sst [smem:[#allocation30_spill]] %s3260_s14 }
   0xc   :  { %3280 = sst [smem:[#allocation31_spill]] %s3262_s16 }
   0xd   :  { %3281 = sst [smem:[#allocation32_spill]] %s3263_s17 }
   0xe   :  { %22 = vsyncpa [#allocation3], 0 }
   0xf   :  { %24 = vsyncpa [#allocation3 + $0x1], 0 }
  0x10   :  { %25 = vsyncpa [#allocation6], 0 }
  0x11   :  { %26 = vsyncpa [#allocation9], 0 }
  0x12   :  { %27 = vsyncpa [#allocation12], 0 }
  0x13   :  { %28 = vsyncpa [#allocation4], 0 }
  0x14   :  { %30 = vsyncpa [#allocation4 + $0x1], 0  ;;  %s2616_s24 = smov 0   ;;  %s2618_s25 = smov 0  }
  0x15   :  { %s2620_s26 = smov 0   ;;  %s2622_s27 = smov 0  }
  0x16 LB: > { %s3282_s3 = sld [smem:[#allocation23_spill]]  ;;  %s2640_s30 = sadd.s32 4294967295, %s2512_s27   ;;  %s2512_s27 = sphi %s2622_s27, %s3308_s27   ;;  %s2508_s26 = sphi %s2620_s26, %s3307_s26   ;;  %s2504_s25 = sphi %s2618_s25, %s3306_s25   ;;  %s2500_s24 = sphi %s2616_s24, %s3305_s24  }
  0x17   : > { %p1756_p0 = scmp.ge.s32.totalorder %s2512_s27, 1  ;;  %p83_p1 = scmp.eq.s32.totalorder %s2640_s30, 0 }
  0x18   : > { %p434_p2 = scmp.lt.s32.totalorder %s2512_s27, 3  ;;  %s2514_s19 = smov [#allocation5]  }
  0x19   : > { %s450_s1 = sshll.u32 %s2514_s19, 4  ;;  %s3284_s9 = sld [smem:[#allocation25_spill]]  ;;  %s451_s1 = int_to_ptr.vmem [resolvable:$true] %s450_s1 }
  0x1a   : > { %p2645_p3 = pnand %p1756_p0, %p434_p2  ;;  %s2515_s28 = smov [#allocation8]  }
  0x1b   : > { %s488_s29 = sshll.u32 %s2515_s28, 4  ;;  %s3267_s19 = smov 128   ;;  %s489_s29 = int_to_ptr.vmem [resolvable:$true] %s488_s29 }
  0x1c   : > { %s448_s0 = sshll.u32 %s3282_s3, 4  ;;  %p2122_p4 = pneg %p2645_p3  ;;  %s449_s0 = int_to_ptr.hbm [resolvable:$true] %s448_s0 }
  0x1d   : > { %s3268_s3 = smov 8   ;;  %s2518_s20 = smov 64  }
  0x1e   : > { %p2657_p6 = pnand %p2122_p4, %p83_p1  ;;  %s2519_s21 = smov 4  }
  0x1f   : > { %s486_s22 = sshll.u32 %s3284_s9, 4  ;;  %s3286_s13 = sld [smem:[#allocation29_spill]]  ;;  %s487_s22 = int_to_ptr.hbm [resolvable:$true] %s486_s22 }
  0x20   : > { %2125 = dma.hbm_to_vmem [thread:$0]  (!%p2657_p6), %s449_s0, 512, %s451_s1, [#allocation6], %s3267_s19, %s3267_s19, %s3268_s3  }
  0x21   : > { %2131 = dma.hbm_to_vmem [thread:$0]  (!%p2657_p6), %s487_s22, 256, %s489_s29, [#allocation9], %s2518_s20, %s2518_s20, %s2519_s21  }
  0x22   : > { %s2520_s14 = smov [#allocation11]   ;;  %s3287_s6 = sld [smem:[#allocation24_spill]] }
  0x23   : > { %s522_s28 = sshll.u32 %s2520_s14, 4  ;;  %s2521_s0 = smov [#allocation7]   ;;  %s523_s28 = int_to_ptr.vmem [resolvable:$true] %s522_s28 }
  0x24   : > { %s471_s1 = sshll.u32 %s2521_s0, 4  ;;  %s3288_s11 = sld [smem:[#allocation27_spill]]  ;;  %s472_s1 = int_to_ptr.vmem [resolvable:$true] %s471_s1 }
  0x25   : > { %s520_s16 = sshll.u32 %s3286_s13, 4  ;;  %s537_s14 = sshll.u32 %s3261_s15, 4  ;;  %s521_s16 = int_to_ptr.hbm [resolvable:$true] %s520_s16  ;;  %s538_s14 = int_to_ptr.hbm [resolvable:$true] %s537_s14 }
  0x26   : > { %2137 = dma.hbm_to_vmem [thread:$0]  (!%p2657_p6), %s521_s16, 256, %s523_s28, [#allocation12], %s2518_s20, %s2518_s20, %s2519_s21  }
  0x27   : > { %s2522_s16 = smov [#allocation10]   ;;  %s2523_s28 = smov [#allocation13]  }
  0x28   : > { %s469_s2 = sshll.u32 %s3287_s6, 4  ;;  %s505_s17 = sshll.u32 %s2522_s16, 4  ;;  %s470_s2 = int_to_ptr.hbm [resolvable:$true] %s469_s2  ;;  %s506_s17 = int_to_ptr.vmem [resolvable:$true] %s505_s17 }
  0x29   : > { %2128 = dma.hbm_to_vmem [thread:$0]  (!%p2657_p6), %s470_s2, 32, %s472_s1, [#allocation6]  }
  0x2a   : > { %s503_s9 = sshll.u32 %s3288_s11, 4  ;;  %s539_s2 = sshll.u32 %s2523_s28, 4  ;;  %s504_s9 = int_to_ptr.hbm [resolvable:$true] %s503_s9  ;;  %s540_s2 = int_to_ptr.vmem [resolvable:$true] %s539_s2 }
  0x2b   : > { %2134 = dma.hbm_to_vmem [thread:$0]  (!%p2657_p6), %s504_s9, 256, %s506_s17, [#allocation9], %s2518_s20, %s2518_s20, %s2519_s21  }
  0x2c   : > { %2140 = dma.hbm_to_vmem [thread:$0]  (!%p2657_p6), %s538_s14, 256, %s540_s2, [#allocation12], %s2518_s20, %s2518_s20, %s2519_s21  }
  0x2d   : > { %s1755_s0 = sadd.s32 4294967294, %s2512_s27   ;;  %s2690_s1 = sadd.s32 1, %s2512_s27  }
  0x2e   : > { %s66_s22 = ssub.s32 %s2512_s27, %s2690_s1  ;;  %s69_s29 = sadd.s32 1, %s2508_s26 }
  0x2f   : > { %p67_p7 = scmp.eq.s32.totalorder %s66_s22, 0  ;;  %p76_p8 = scmp.ne.s32.totalorder %s2508_s26, %s2504_s25 }
  0x30   : > { %p77_p9 = scmp.eq.s32.totalorder %s2512_s27, 0  ;;  %p82_p10 = scmp.ne.s32.totalorder %s2504_s25, %s2500_s24 }
  0x31   : > { %s2701_s9 = scalar_select %p67_p7, %s2508_s26, %s69_s29  }
  0x32   : > { %p2703_p11 = por %p77_p9, %p76_p8  ;;  %p2709_p12 = por %p83_p1, %p82_p10 }
  0x33   : > { %p421_p13 = scmp.eq.s32.totalorder %s2640_s30, 1  ;;  %p427_p0 = scmp.eq.s32.totalorder %s1755_s0, 1 }
  0x34   : > { %p2155_p2 = scmp.lt.s32.totalorder %s2512_s27, 2  ;;  %s564_s20 = sand.u32 1, %s2508_s26  }
  0x35   : > { %p2716_p4 = por %p421_p13, %p76_p8  ;;  %p2720_p6 = por %p427_p0, %p82_p10 }
  0x36   : > { %s1764_s14 = sshll.u32 %s564_s20, 4  ;;  %s2031_s16 = sshll.u32 %s2512_s27, 4 }
  0x37   : > { %s3293_s2 = sld [smem:[#allocation21_spill]]  ;;  %s568_s29 = scalar_lea.vmem [#allocation2], %s1764_s14 }
  0x38   : > { %s576_s19 = sshll.u32 %s568_s29, 4  ;;  %p2730_p7 = pnand %p2155_p2, %p2703_p11  ;;  %s577_s19 = int_to_ptr.vmem [resolvable:$true] %s576_s19 }
  0x39   : > { %s565_s6 = scalar_lea.sflag [#allocation3], %s564_s20 }
  0x3a   : > { %p2408_p9 = pneg %p2730_p7 }
  0x3d   : > { %s573_s22 = scalar_lea.hbm %s3293_s2, %s2031_s16  ;;  %s2411_s17 = scalar_lea.hbm %s3293_s2, 32 }
  0x3e   : > { %s574_s3 = sshll.u32 %s573_s22, 4  ;;  %s575_s3 = int_to_ptr.hbm [resolvable:$true] %s574_s3 }
  0x3f   : > { %s2404_s11 = sshra.s32 %s575_s3, 4  ;;  %s2405_s11 = int_to_ptr.hbm [resolvable:$true] %s2404_s11 }
  0x40   : > { %s2406_s13 = scalar_lea.hbm %s2405_s11, 16  ;;  %p2412_p11 = scmp.lt.s32.totalorder %s2405_s11, %s3293_s2 }
  0x41   : > { %p2407_p8 = scmp.ne.s32.totalorder %s2405_s11, %s2406_s13  ;;  %p2413_p0 = scmp.lt.s32.totalorder %s2411_s17, %s2406_s13 }
  0x43   : > { %p2409_p10 = pnand %p2408_p9, %p2407_p8  ;;  %p2414_p2 = por %p2413_p0, %p2412_p11 }
  0x45   : > { %p2410_p13 = pneg %p2409_p10 }
  0x47   : > { %p2415_p5 = pnand %p2414_p2, %p2410_p13 }
  0x49   : > { %2418 = shalt.err (!%p2415_p5)
}
  0x4a   : > { %s3295_s20 = smov 8   ;;  %s3296_s22 = smov 128  }
  0x4b   : > { %2144 = dma.hbm_to_vmem [thread:$0]  (!%p2730_p7), %s575_s3, 256, %s577_s19, %s565_s6, %s3296_s22, %s3296_s22, %s3295_s20  }
  0x4c   : > { %588 = sbr.rel (%p2645_p3) target bundleno = 1589 (0x635), region = 88  ;;  %s2750_s29 = sand.u32 (!%p2645_p3), 1, %s2504_s25  }
  0x4d   : > { %s1768_s11 = sshll.u32 (!%p2645_p3), %s2750_s29, 4  ;;  %s591_s13 = scalar_lea.sflag (!%p2645_p3), [#allocation3], %s2750_s29 }
  0x4e   : > { %s2756_s14 = scalar_lea.vmem (!%p2645_p3), [#allocation2], %s1768_s11 }
  0x51   : > { %2479 = dma.done.wait (%p2709_p12), %s591_s13, 256  }
  0x52   : > { %2481 = vsyncadd (%p2709_p12), %s591_s13, 4294967040 }
  0x53   : > { %2483 = dma.done.wait (%p83_p1), [#allocation6], 544  }
  0x54   : > { %2485 = vsyncadd (%p83_p1), [#allocation6], 4294966752 }
  0x55   : > { %2487 = dma.done.wait (%p83_p1), [#allocation9], 512  }
  0x56   : > { %2489 = vsyncadd (%p83_p1), [#allocation9], 4294966784 }
  0x57   : > { %2491 = dma.done.wait (%p83_p1), [#allocation12], 512  }
  0x58   : > { %2493 = vsyncadd (%p83_p1), [#allocation12], 4294966784  ;;  %p681_p3 = scmp.lt.s32.totalorder %s2640_s30, 1  ;;  %s3297_s23 = sld [smem:[#allocation20_spill]]  ;;  %v1788_v0 = vld [vmem:[#allocation5 + $0x10] sm:$0xf] }
  0x59   : > { %v2036_v1 = vld [vmem:[#allocation5 + $0x14] sm:$0xf0]  ;;  %v2035_v2 = vld [vmem:[#allocation5 + $0x14] sm:$0xf]  ;;  %v1790_v4 = vld [vmem:[#allocation5 + $0x18] sm:$0xf0] }
  0x5a   : > { %s682_s3 = scalar_select %p681_p3, %s2640_s30, 1  ;;  %v1789_v3 = vor.u32 %v2036_v1, %v1788_v0  ;;  %v1780_v5 = vld [vmem:[#allocation5] sm:$0xf]  ;;  %v2034_v6 = vld [vmem:[#allocation5 + $0x4] sm:$0xf0]  ;;  %v1793_v7 = vor.u32 %v2035_v2, %v1790_v4  ;;  %vm720_vm0 = vcmask 261120  }
  0x5b   : > { %v2033_v8 = vld [vmem:[#allocation5 + $0x4] sm:$0xf]  ;;  %v1782_v9 = vld [vmem:[#allocation5 + $0x8] sm:$0xf0]  ;;  %v1781_v11 = vor.u32 %v2034_v6, %v1780_v5  ;;  %v1854_v13 = vld [vmem:[%s3251_s5 + $0x70] sm:$0xf] }
  0x5c   : > { %s2032_s6 = sshll.u32 %s682_s3, 4  ;;  %730 = vmatpush.bf16.msra.mxu0 %v1789_v3  ;;  %v2052_v14 = vld [vmem:[%s3251_s5 + $0x74] sm:$0xf0]  ;;  %744 = vmatpush.bf16.msra.mxu2 %v1793_v7  ;;  %v1785_v15 = vor.u32 %v2033_v8, %v1782_v9  ;;  %v2051_v16 = vld [vmem:[%s3251_s5 + $0x74] sm:$0xf]  ;;  %s3298_s19 = sld [smem:[#allocation22_spill]] }
  0x5d   : > { %v1856_v17 = vld [vmem:[%s3251_s5 + $0x78] sm:$0xf0]  ;;  %v1846_v18 = vld [vmem:[%s3251_s5 + $0x60] sm:$0xf]  ;;  %v1855_v19 = vor.u32 %v2052_v14, %v1854_v13  ;;  %v2050_v21 = vld [vmem:[%s3251_s5 + $0x64] sm:$0xf0] }
  0x5e   : > { %s685_s0 = scalar_lea.vmem %s3297_s23, %s2032_s6  ;;  %v1859_v20 = vor.u32 %v2051_v16, %v1856_v17  ;;  %v2049_v22 = vld [vmem:[%s3251_s5 + $0x64] sm:$0xf]  ;;  %v1848_v23 = vld [vmem:[%s3251_s5 + $0x68] sm:$0xf0]  ;;  %v1918_v25 = vld [vmem:[%s3251_s5 + $0xf0] sm:$0xf]  ;;  %v1847_v35 = vor.u32 %v2050_v21, %v1846_v18 }
  0x5f   : > { %v687_v10 = vld [vmem:[%s685_s0] sm:$0xff]  ;;  %v688_v12 = vld [vmem:[%s685_s0 + $0x8] sm:$0xff]  ;;  %v2068_v26 = vld [vmem:[%s3251_s5 + $0xf4] sm:$0xf0]  ;;  %v1851_v30 = vor.u32 %v2049_v22, %v1848_v23  ;;  %s3299_s28 = sld [smem:[#allocation28_spill]]  ;;  %vm1564_vm1 = vcmask 130048  }
  0x60   : > { %v689_v24 = vpack.c.bf16 %v688_v12, %v687_v10  ;;  %v2067_v27 = vld [vmem:[%s3251_s5 + $0xf4] sm:$0xf]  ;;  %731 = vmatpush.bf16.msra.mxu0 %v1781_v11  ;;  %v1919_v28 = vor.u32 %v2068_v26, %v1918_v25  ;;  %v1920_v29 = vld [vmem:[%s3251_s5 + $0xf8] sm:$0xf0]  ;;  %745 = vmatpush.bf16.msra.mxu2 %v1785_v15  ;;  %v1910_v34 = vld [vmem:[%s3251_s5 + $0xe0] sm:$0xf] }
  0x61   : > { %v1923_v31 = vor.u32 %v2067_v27, %v1920_v29  ;;  %v2047_v32 = vld [vmem:[%s3251_s5 + $0x54] sm:$0xf]  ;;  %v1840_v33 = vld [vmem:[%s3251_s5 + $0x58] sm:$0xf0]  ;;  %v2066_v36 = vld [vmem:[%s3251_s5 + $0xe4] sm:$0xf0] }
  0x62   : > { %970 = vmatpush.bf16.msra.mxu3 %v1919_v28  ;;  %v2065_v37 = vld [vmem:[%s3251_s5 + $0xe4] sm:$0xf]  ;;  %v1912_v38 = vld [vmem:[%s3251_s5 + $0xe8] sm:$0xf0]  ;;  %v1838_v39 = vld [vmem:[%s3251_s5 + $0x50] sm:$0xf]  ;;  %v1911_v41 = vor.u32 %v2066_v36, %v1910_v34  ;;  %v1843_v45 = vor.u32 %v2047_v32, %v1840_v33 }
  0x63   : > { %1794 = vmatmul.msk.bf16.vlgmr.msra.gmra.mxu0 %vm720_vm0, %v689_v24  ;;  %998 = vmatpush.bf16.msra.mxu1 %v1923_v31  ;;  %v2048_v40 = vld [vmem:[%s3251_s5 + $0x54] sm:$0xf0]  ;;  %v1915_v42 = vor.u32 %v2065_v37, %v1912_v38  ;;  %v1902_v43 = vld [vmem:[%s3251_s5 + $0xd0] sm:$0xf]  ;;  %v1830_v46 = vld [vmem:[%s3251_s5 + $0x40] sm:$0xf] }
  0x64   : > { %984 = vmatpush.bf16.msrb.mxu0 %v1859_v20  ;;  %956 = vmatpush.bf16.msrb.mxu2 %v1855_v19  ;;  %v2064_v44 = vld [vmem:[%s3251_s5 + $0xd4] sm:$0xf0]  ;;  %v2046_v47 = vld [vmem:[%s3251_s5 + $0x44] sm:$0xf0]  ;;  %v2045_v48 = vld [vmem:[%s3251_s5 + $0x44] sm:$0xf]  ;;  %v1839_v51 = vor.u32 %v2048_v40, %v1838_v39 }
  0x65   : > { %1795 = vmatmul.msk.bf16.vlgmr.msra.gmra.mxu2 %vm720_vm0, %v689_v24  ;;  %v2063_v49 = vld [vmem:[%s3251_s5 + $0xd4] sm:$0xf]  ;;  %v1904_v50 = vld [vmem:[%s3251_s5 + $0xd8] sm:$0xf0]  ;;  %v1832_v52 = vld [vmem:[%s3251_s5 + $0x48] sm:$0xf0]  ;;  %v1903_v53 = vor.u32 %v2064_v44, %v1902_v43  ;;  %v1831_v56 = vor.u32 %v2046_v47, %v1830_v46 }
  0x66   : > { %971 = vmatpush.bf16.msra.mxu3 %v1911_v41  ;;  %v1907_v54 = vor.u32 %v2063_v49, %v1904_v50  ;;  %v1835_v55 = vor.u32 %v2045_v48, %v1832_v52  ;;  %v1822_v57 = vld [vmem:[%s3251_s5 + $0x30] sm:$0xf]  ;;  %v2044_v58 = vld [vmem:[%s3251_s5 + $0x34] sm:$0xf0]  ;;  %v2043_v59 = vld [vmem:[%s3251_s5 + $0x34] sm:$0xf] }
  0x67   : > { %999 = vmatpush.bf16.msra.mxu1 %v1915_v42  ;;  %v1823_v60 = vor.u32 %v2044_v58, %v1822_v57  ;;  %v1824_v61 = vld [vmem:[%s3251_s5 + $0x38] sm:$0xf0]  ;;  %v1894_v63 = vld [vmem:[%s3251_s5 + $0xc0] sm:$0xf]  ;;  %v2062_v0 = vld [vmem:[%s3251_s5 + $0xc4] sm:$0xf0] }
  0x68   : > { %985 = vmatpush.bf16.msrb.mxu0 %v1851_v30  ;;  %957 = vmatpush.bf16.msrb.mxu2 %v1847_v35  ;;  %v1827_v62 = vor.u32 %v2043_v59, %v1824_v61  ;;  %v2061_v1 = vld [vmem:[%s3251_s5 + $0xc4] sm:$0xf]  ;;  %v1895_v2 = vor.u32 %v2062_v0, %v1894_v63  ;;  %v1896_v3 = vld [vmem:[%s3251_s5 + $0xc8] sm:$0xf0]  ;;  %v1814_v5 = vld [vmem:[%s3251_s5 + $0x20] sm:$0xf] }
  0x69   : > { %v1899_v4 = vor.u32 %v2061_v1, %v1896_v3  ;;  %v2042_v6 = vld [vmem:[%s3251_s5 + $0x24] sm:$0xf0]  ;;  %v2041_v7 = vld [vmem:[%s3251_s5 + $0x24] sm:$0xf]  ;;  %v1816_v9 = vld [vmem:[%s3251_s5 + $0x28] sm:$0xf0] }
  0x6a   : > { %972 = vmatpush.bf16.msra.mxu3 %v1903_v53  ;;  %v1815_v8 = vor.u32 %v2042_v6, %v1814_v5  ;;  %v1819_v10 = vor.u32 %v2041_v7, %v1816_v9  ;;  %v1886_v11 = vld [vmem:[%s3251_s5 + $0xb0] sm:$0xf]  ;;  %v2060_v12 = vld [vmem:[%s3251_s5 + $0xb4] sm:$0xf0]  ;;  %v2059_v13 = vld [vmem:[%s3251_s5 + $0xb4] sm:$0xf] }
  0x6b   : > { %1000 = vmatpush.bf16.msra.mxu1 %v1907_v54  ;;  %v1887_v14 = vor.u32 %v2060_v12, %v1886_v11  ;;  %v1888_v15 = vld [vmem:[%s3251_s5 + $0xb8] sm:$0xf0]  ;;  %v1806_v17 = vld [vmem:[%s3251_s5 + $0x10] sm:$0xf]  ;;  %v2040_v18 = vld [vmem:[%s3251_s5 + $0x14] sm:$0xf0] }
  0x6c   : > { %986 = vmatpush.bf16.msrb.mxu0 %v1843_v45  ;;  %958 = vmatpush.bf16.msrb.mxu2 %v1839_v51  ;;  %v1891_v16 = vor.u32 %v2059_v13, %v1888_v15  ;;  %v2039_v19 = vld [vmem:[%s3251_s5 + $0x14] sm:$0xf]  ;;  %v1807_v20 = vor.u32 %v2040_v18, %v1806_v17  ;;  %v1808_v21 = vld [vmem:[%s3251_s5 + $0x18] sm:$0xf0]  ;;  %v1878_v23 = vld [vmem:[%s3251_s5 + $0xa0] sm:$0xf] }
  0x6d   : > { %v1811_v22 = vor.u32 %v2039_v19, %v1808_v21  ;;  %v2058_v24 = vld [vmem:[%s3251_s5 + $0xa4] sm:$0xf0]  ;;  %v2057_v25 = vld [vmem:[%s3251_s5 + $0xa4] sm:$0xf]  ;;  %v1880_v27 = vld [vmem:[%s3251_s5 + $0xa8] sm:$0xf0] }
  0x6e   : > { %973 = vmatpush.bf16.msra.mxu3 %v1895_v2  ;;  %v1879_v26 = vor.u32 %v2058_v24, %v1878_v23  ;;  %v1883_v28 = vor.u32 %v2057_v25, %v1880_v27  ;;  %v1798_v29 = vld [vmem:[%s3251_s5] sm:$0xf]  ;;  %v2038_v30 = vld [vmem:[%s3251_s5 + $0x4] sm:$0xf0]  ;;  %v2037_v31 = vld [vmem:[%s3251_s5 + $0x4] sm:$0xf] }
  0x6f   : > { %1001 = vmatpush.bf16.msra.mxu1 %v1899_v4  ;;  %v1799_v32 = vor.u32 %v2038_v30, %v1798_v29  ;;  %v1800_v33 = vld [vmem:[%s3251_s5 + $0x8] sm:$0xf0]  ;;  %v1870_v35 = vld [vmem:[%s3251_s5 + $0x90] sm:$0xf]  ;;  %v2056_v36 = vld [vmem:[%s3251_s5 + $0x94] sm:$0xf0] }
  0x70   : > { %987 = vmatpush.bf16.msrb.mxu0 %v1835_v55  ;;  %959 = vmatpush.bf16.msrb.mxu2 %v1831_v56  ;;  %v1803_v34 = vor.u32 %v2037_v31, %v1800_v33  ;;  %v2055_v37 = vld [vmem:[%s3251_s5 + $0x94] sm:$0xf]  ;;  %v1871_v38 = vor.u32 %v2056_v36, %v1870_v35  ;;  %v1872_v39 = vld [vmem:[%s3251_s5 + $0x98] sm:$0xf0]  ;;  %v1862_v41 = vld [vmem:[%s3251_s5 + $0x80] sm:$0xf] }
  0x71   : > { %v1875_v40 = vor.u32 %v2055_v37, %v1872_v39  ;;  %v2054_v42 = vld [vmem:[%s3251_s5 + $0x84] sm:$0xf0]  ;;  %v2053_v43 = vld [vmem:[%s3251_s5 + $0x84] sm:$0xf]  ;;  %v1864_v45 = vld [vmem:[%s3251_s5 + $0x88] sm:$0xf0] }
  0x72   : > { %974 = vmatpush.bf16.msra.mxu3 %v1887_v14  ;;  %v1863_v44 = vor.u32 %v2054_v42, %v1862_v41  ;;  %v1867_v46 = vor.u32 %v2053_v43, %v1864_v45  ;;  %v2084_v47 = vld [vmem:[%s3253_s7 + $0x78] sm:$0xff]  ;;  %v2083_v49 = vld [vmem:[%s3253_s7 + $0x70] sm:$0xff]  ;;  %v2082_v50 = vld [vmem:[%s3253_s7 + $0x68] sm:$0xff]  ;;  %s3300_s18 = sld [smem:[#allocation26_spill]]  ;;  %s680_s6 = scalar_lea.vmem [#allocation14], %s1768_s11 }
  0x73   : > { %1002 = vmatpush.bf16.msra.mxu1 %v1891_v16  ;;  %v2076_v48 = vld [vmem:[%s3253_s7 + $0x38] sm:$0xff]  ;;  %v694_v51 = vld [vmem:[%s3250_s4] sm:$0x3]  ;;  %v2075_v4 = vld [vmem:[%s3253_s7 + $0x30] sm:$0xff]  ;;  %s3301_s16 = sld [smem:[#allocation30_spill]] }
  0x74   : > { %960 = vmatpush.bf16.msrb.mxu2 %v1823_v60  ;;  %988 = vmatpush.bf16.msrb.mxu0 %v1827_v62  ;;  %v696_v53 = vperm.slane %v694_v51, 0  ;;  %v697_v58 = vperm.slane %v694_v51, 1  ;;  %v2081_v5 = vld [vmem:[%s3253_s7 + $0x60] sm:$0xff]  ;;  %v2074_v6 = vld [vmem:[%s3253_s7 + $0x28] sm:$0xff]  ;;  %v2080_v7 = vld [vmem:[%s3253_s7 + $0x58] sm:$0xff]  ;;  %s3302_s10 = sld [smem:[#allocation31_spill]] }
  0x75   : > { %v2079_v9 = vld [vmem:[%s3253_s7 + $0x50] sm:$0xff]  ;;  %v2078_v11 = vld [vmem:[%s3253_s7 + $0x48] sm:$0xff]  ;;  %v2077_v13 = vld [vmem:[%s3253_s7 + $0x40] sm:$0xff]  ;;  %s3303_s13 = sld [smem:[#allocation32_spill]] }
  0x76   : > { %975 = vmatpush.bf16.msra.mxu3 %v1879_v26  ;;  %v2071_v12 = vld [vmem:[%s3253_s7 + $0x10] sm:$0xff]  ;;  %v2070_v14 = vld [vmem:[%s3253_s7 + $0x8] sm:$0xff]  ;;  %v2069_v15 = vld [vmem:[%s3253_s7] sm:$0xff] }
  0x77   : > { %1003 = vmatpush.bf16.msra.mxu1 %v1883_v28  ;;  %v790_v17 = vld [vmem:[#allocation7] sm:$0x3]  ;;  %v2086_v41 = vld [vmem:[#allocation8 + $0x8] sm:$0xff]  ;;  %v2085_v43 = vld [vmem:[#allocation8] sm:$0xff] }
  0x78   : > { %961 = vmatpush.bf16.msrb.mxu2 %v1815_v8  ;;  %989 = vmatpush.bf16.msrb.mxu0 %v1819_v10  ;;  %v2073_v8 = vld [vmem:[%s3253_s7 + $0x20] sm:$0xff]  ;;  %v2072_v10 = vld [vmem:[%s3253_s7 + $0x18] sm:$0xff]  ;;  %v792_v24 = vperm.slane %v790_v17, 0  ;;  %v2090_v45 = vld [vmem:[#allocation11 + $0x8] sm:$0xff] }
  0x79   : > { %v2088_v42 = vld [vmem:[#allocation10 + $0x8] sm:$0xff] }
  0x7a   : > { %976 = vmatpush.bf16.msra.mxu3 %v1871_v38 }
  0x7b   : > { %1004 = vmatpush.bf16.msra.mxu1 %v1875_v40 }
  0x7c   : > { %962 = vmatpush.bf16.msrb.mxu2 %v1807_v20  ;;  %990 = vmatpush.bf16.msrb.mxu0 %v1811_v22  ;;  %v793_v20 = vperm.slane %v790_v17, 1  ;;  %v3105_v17 = vld [vmem:[%s3298_s19 + $0x10] sm:$0xff] }
  0x7e   : > { %977 = vmatpush.bf16.msra.mxu3 %v1863_v44  ;;  %v2087_v44 = vld [vmem:[#allocation10] sm:$0xff] }
  0x7f   : > { %1005 = vmatpush.bf16.msra.mxu1 %v1867_v46  ;;  %v2089_v46 = vld [vmem:[#allocation11] sm:$0xff] }
  0x80   : > { %963 = vmatpush.bf16.msrb.mxu2 %v1799_v32  ;;  %991 = vmatpush.bf16.msrb.mxu0 %v1803_v34 }
  0x82   : > { %1164 = vmatpush.bf16.msrb.mxu3 %v2084_v47 }
  0x83   : > { %1244 = vmatpush.bf16.msrb.mxu1 %v2088_v42 }
  0x84   : > { %1150 = vmatpush.bf16.msra.mxu2 %v2076_v48  ;;  %1208 = vmatpush.bf16.msra.mxu0 %v2086_v41 }
  0x86   : > { %1165 = vmatpush.bf16.msrb.mxu3 %v2083_v49  ;;  %v2207_v49 = vld [vmem:[%s3254_s8] ss:$0 sm:$0xff] }
  0x87   : > { %1245 = vmatpush.bf16.msrb.mxu1 %v2087_v44 }
  0x88   : > { %1151 = vmatpush.bf16.msra.mxu2 %v2075_v4  ;;  %1209 = vmatpush.bf16.msra.mxu0 %v2085_v43  ;;  %v3072_v4 = vld [vmem:[%s3298_s19 + $0x38] sm:$0xff] }
  0x8a   : > { %1166 = vmatpush.bf16.msrb.mxu3 %v2082_v50 }
  0x8c   : > { %1152 = vmatpush.bf16.msra.mxu2 %v2074_v6  ;;  %v2208_v6 = vld [vmem:[%s3300_s18] ss:$0 sm:$0xff]  ;;  %s1610_s18 = sshll.u32 %s680_s6, 4  ;;  %s1611_s18 = int_to_ptr.vmem [resolvable:$true] %s1610_s18 }
  0x8e   : > { %1167 = vmatpush.bf16.msrb.mxu3 %v2081_v5  ;;  %v3078_v5 = vld [vmem:[%s3298_s19 + $0x30] sm:$0xff] }
  0x90   : > { %1153 = vmatpush.bf16.msra.mxu2 %v2073_v8  ;;  %v3087_v8 = vld [vmem:[%s3298_s19 + $0x28] sm:$0xff] }
  0x92   : > { %1168 = vmatpush.bf16.msrb.mxu3 %v2080_v7 }
  0x94   : > { %1154 = vmatpush.bf16.msra.mxu2 %v2072_v10 }
  0x96   : > { %1169 = vmatpush.bf16.msrb.mxu3 %v2079_v9  ;;  %v3093_v9 = vld [vmem:[%s3298_s19 + $0x20] sm:$0xff] }
  0x98   : > { %1155 = vmatpush.bf16.msra.mxu2 %v2071_v12 }
  0x9a   : > { %1170 = vmatpush.bf16.msrb.mxu3 %v2078_v11 }
  0x9c   : > { %1156 = vmatpush.bf16.msra.mxu2 %v2070_v14  ;;  %v3099_v14 = vld [vmem:[%s3298_s19 + $0x18] sm:$0xff] }
  0x9e   : > { %1171 = vmatpush.bf16.msrb.mxu3 %v2077_v13 }
  0xa0   : > { %1157 = vmatpush.bf16.msra.mxu2 %v2069_v15 }
  0xe0   : > { %v733_v52 = vpop.f32.mrf.mxu0 }
  0xe1   : > { %v734_v54 = vadd.f32 %v733_v52, %v696_v53 }
  0xe3   : > { %v752_v59 = vmax.f32 %v734_v54, 0.0 }
  0xe8   : > { %v747_v55 = vpop.f32.mrf.mxu2  ;;  %v735_v56 = vpop.f32.mrf.mxu0 }
  0xe9   : > { %v736_v57 = vadd.f32 %v735_v56, %v696_v53  ;;  %v748_v62 = vadd.f32 %v747_v55, %v697_v58 }
  0xeb   : > { %v754_v60 = vmax.f32 %v736_v57, 0.0  ;;  %v753_v1 = vmax.f32 %v748_v62, 0.0  ;;  %v1305_v57 = vld [vmem:[%s3298_s19 + $0x78] sm:$0xff]  ;;  %v3051_v62 = vld [vmem:[%s3298_s19 + $0x50] sm:$0xff] }
  0xed   : > { %v756_v61 = vpack.c.bf16 %v754_v60, %v752_v59  ;;  %v1303_v59 = vld [vmem:[%s3298_s19 + $0x68] sm:$0xff]  ;;  %v1302_v60 = vld [vmem:[%s3298_s19 + $0x60] sm:$0xff] }
  0xef   : > { %964 = vmatmul.bf16.vlgmr.msrb.gmra.mxu2 %v756_v61  ;;  %992 = vmatmul.bf16.vlgmr.msrb.gmra.mxu0 %v756_v61  ;;  %v3045_v61 = vld [vmem:[%s3298_s19 + $0x58] sm:$0xff] }
  0xf0   : > { %v749_v63 = vpop.f32.mrf.mxu2  ;;  %1280 = vmatpush.bf16.msrb.mxu0 %v2090_v45 }
  0xf1   : > { %v750_v0 = vadd.f32 %v749_v63, %v697_v58  ;;  %v1304_v58 = vld [vmem:[%s3298_s19 + $0x70] sm:$0xff]  ;;  %v3057_v63 = vld [vmem:[%s3298_s19 + $0x48] sm:$0xff] }
  0xf3   : > { %v755_v2 = vmax.f32 %v750_v0, 0.0  ;;  %v3063_v0 = vld [vmem:[%s3298_s19 + $0x40] sm:$0xff] }
  0xf4   : > { %1281 = vmatpush.bf16.msrb.mxu0 %v2089_v46 }
  0xf5   : > { %v757_v3 = vpack.c.bf16 %v755_v2, %v753_v1  ;;  %v2209_v1 = vld [vmem:[%s3299_s28] ss:$0 sm:$0xff]  ;;  %s2454_s28 = scalar_lea.hbm %s3303_s13, 32 }
  0xf7   : > { %978 = vmatmul.bf16.vlgmr.msra.gmra.mxu3 %v757_v3  ;;  %1006 = vmatmul.bf16.vlgmr.msra.gmra.mxu1 %v757_v3 }
  0xf8   : > { %1473 = vmatpush.msra.mxu3 %v1305_v57 }
  0xfa   : > { %1474 = vmatpush.msra.mxu3 %v1304_v58 }
  0xfc   : > { %1475 = vmatpush.msra.mxu3 %v1303_v59 }
  0xfe   : > { %1476 = vmatpush.msra.mxu3 %v1302_v60 }
 0x100   : > { %1477 = vmatpush.msra.mxu3 %v3045_v61 }
 0x102   : > { %1478 = vmatpush.msra.mxu3 %v3051_v62 }
 0x104   : > { %1479 = vmatpush.msra.mxu3 %v3057_v63 }
 0x106   : > { %1480 = vmatpush.msra.mxu3 %v3063_v0 }
 0x108   : > { %1481 = vmatpush.msra.mxu3 %v3072_v4 }
 0x10a   : > { %1482 = vmatpush.msra.mxu3 %v3078_v5 }
 0x10c   : > { %1483 = vmatpush.msra.mxu3 %v3087_v8 }
 0x10e   : > { %1484 = vmatpush.msra.mxu3 %v3093_v9 }
 0x110   : > { %1485 = vmatpush.msra.mxu3 %v3099_v14 }
 0x112   : > { %1486 = vmatpush.msra.mxu3 %v3105_v17 }
 0x16c   : > { %v993_v16 = vpop.f32.mrf.mxu0 }
 0x16d   : > { %v994_v22 = vadd.f32 %v993_v16, %v793_v20 }
 0x172   : > { %v965_v18 = vpop.f32.mrf.mxu2 }
 0x173   : > { %v966_v30 = vadd.f32 %v965_v18, %v792_v24 }
 0x174   : > { %v1007_v19 = vpop.f32.mrf.mxu1  ;;  %v995_v21 = vpop.f32.mrf.mxu0 }
 0x175   : > { %v1008_v25 = vadd.f32 %v1007_v19, %v994_v22  ;;  %v996_v26 = vadd.f32 %v995_v21, %v793_v20  ;;  %v3111_v22 = vld [vmem:[%s3298_s19 + $0x8] sm:$0xff] }
 0x176   : > { %1487 = vmatpush.msra.mxu3 %v3111_v22 }
 0x177   : > { %v1013_v31 = vmax.f32 %v1008_v25, 0.0  ;;  %v1320_v25 = vpack.c.bf16 %v1304_v58, %v1304_v58 }
 0x17a   : > { %v979_v23 = vpop.f32.mrf.mxu3  ;;  %v967_v29 = vpop.f32.mrf.mxu2 }
 0x17b   : > { %v980_v33 = vadd.f32 %v979_v23, %v966_v30  ;;  %v968_v34 = vadd.f32 %v967_v29, %v792_v24  ;;  %v2210_v30 = vld [vmem:[%s3301_s16] ss:$0 sm:$0xff] }
 0x17c   : > { %v1009_v27 = vpop.f32.mrf.mxu1 }
 0x17d   : > { %v1010_v28 = vadd.f32 %v1009_v27, %v996_v26  ;;  %v1012_v38 = vmax.f32 %v980_v33, 0.0  ;;  %v1321_v26 = vpack.c.bf16 %v1305_v57, %v1305_v57  ;;  %v3119_v27 = vld [vmem:[%s3298_s19] sm:$0xff] }
 0x17e   : > { %1488 = vmatpush.msra.mxu3 %v3119_v27 }
 0x17f   : > { %v1015_v32 = vmax.f32 %v1010_v28, 0.0 }
 0x181   : > { %v1017_v35 = vpack.c.bf16 %v1015_v32, %v1013_v31  ;;  %v1318_v32 = vpack.c.bf16 %v1302_v60, %v1302_v60 }
 0x182   : > { %v981_v36 = vpop.f32.mrf.mxu3 }
 0x183   : > { %v982_v37 = vadd.f32 %v981_v36, %v968_v34  ;;  %1172 = vmatmul.bf16.vlgmr.msrb.gmra.mxu3 %v1017_v35  ;;  %v1346_v34 = vunpack.c.l.bf16 %v1320_v25  ;;  %v1347_v35 = vunpack.c.l.bf16 %v1321_v26  ;;  %v1319_v36 = vpack.c.bf16 %v1303_v59, %v1303_v59 }
 0x184   : > { %v1344_v42 = vunpack.c.l.bf16 %v1318_v32  ;;  %v1313_v25 = vpack.c.bf16 %v3072_v4, %v3072_v4 }
 0x185   : > { %v1014_v39 = vmax.f32 %v982_v37, 0.0  ;;  %v1345_v43 = vunpack.c.l.bf16 %v1319_v36 }
 0x187   : > { %v1016_v40 = vpack.c.bf16 %v1014_v39, %v1012_v38 }
 0x189   : > { %1158 = vmatmul.bf16.vlgmr.msra.gmra.mxu2 %v1016_v40 }
 0x206   : > { %v1173_v47 = vpop.f32.mrf.mxu3 }
 0x20c   : > { %v1159_v48 = vpop.f32.mrf.mxu2 }
 0x20d   : > { %v1160_v50 = vadd.f32 %v2207_v49, %v1159_v48  ;;  %v1317_v48 = vpack.c.bf16 %v3045_v61, %v3045_v61  ;;  %v1315_v61 = vpack.c.bf16 %v3057_v63, %v3057_v63 }
 0x20e   : > { %v1175_v53 = vpop.f32.mrf.mxu3 }
 0x20f   : > { %v1174_v54 = vadd.f32 %v1173_v47, %v1160_v50  ;;  %v1316_v47 = vpack.c.bf16 %v3051_v62, %v3051_v62  ;;  %v1343_v58 = vunpack.c.l.bf16 %v1317_v48  ;;  %v1314_v62 = vpack.c.bf16 %v3063_v0, %v3063_v0 }
 0x211   : > { %v1342_v57 = vunpack.c.l.bf16 %v1316_v47 }
 0x214   : > { %v1161_v51 = vpop.f32.mrf.mxu2 }
 0x215   : > { %v1162_v52 = vadd.f32 %v2207_v49, %v1161_v51 }
 0x217   : > { %v1176_v55 = vadd.f32 %v1175_v53, %v1162_v52 }
 0x219   : > { %v1178_v56 = vpack.c.bf16 %v1176_v55, %v1174_v54 }
 0x21b   : > { %1996 = vmatmul.msk.bf16.vlgmr.msra.gmra.mxu0 %vm720_vm0, %v1178_v56  ;;  %2005 = vmatmul.msk.bf16.vlgmr.msrb.gmra.mxu1 %vm720_vm0, %v1178_v56 }
 0x22b   : > { %2014 = vmatmul.msk.bf16.vlgmr.msrb.gmra.mxu0 %vm720_vm0, %v1178_v56 }
 0x298   : > { %v1211_v2 = vpop.f32.mrf.mxu0  ;;  %v1247_v3 = vpop.f32.mrf.mxu1 }
 0x299   : > { %v1248_v7 = vadd.f32 %v2209_v1, %v1247_v3  ;;  %v1212_v10 = vadd.f32 %v2208_v6, %v1211_v2 }
 0x29b   : > { %v1252_v11 = vmax.f32 %v1248_v7, 0.0  ;;  %v1216_v18 = vmax.f32 %v1212_v10, 0.0 }
 0x29d   : > { %v1322_v19 = vpack.c.bf16 %v1252_v11, %v1252_v11  ;;  %v1340_v11 = vunpack.c.l.bf16 %v1314_v62 }
 0x29f   : > { %v1326_v28 = vunpack.c.l.b16 %v1322_v19  ;;  %v1312_v19 = vpack.c.bf16 %v3078_v5, %v3078_v5  ;;  %v1339_v5 = vunpack.c.l.bf16 %v1313_v25  ;;  %v2092_v25 = vld [vmem:[#allocation13 + $0x8] sm:$0xff] }
 0x2a0   : > { %v1213_v12 = vpop.f32.mrf.mxu0  ;;  %v1249_v13 = vpop.f32.mrf.mxu1  ;;  %1530 = vmatpush.bf16.msra.mxu0 %v2092_v25 }
 0x2a1   : > { %v1214_v15 = vadd.f32 %v2208_v6, %v1213_v12  ;;  %v1250_v16 = vadd.f32 %v2209_v1, %v1249_v13 }
 0x2a3   : > { %v1217_v20 = vmax.f32 %v1214_v15, 0.0  ;;  %v1253_v21 = vmax.f32 %v1250_v16, 0.0  ;;  %v1341_v15 = vunpack.c.l.bf16 %v1315_v61 }
 0x2a5   : > { %v3113_v23 = vpack.c.bf16 %v1217_v20, %v1216_v18  ;;  %v1323_v24 = vpack.c.bf16 %v1253_v21, %v1253_v21 }
 0x2a7   : > { %v1327_v29 = vunpack.c.l.b16 %v1323_v24 }
 0x2a8   : > { %v1283_v31 = vpop.f32.mrf.mxu0 }
 0x2a9   : > { %v1328_v33 = vpack.c.b16 %v1327_v29, %v1326_v28  ;;  %v1284_v39 = vadd.f32 %v2210_v30, %v1283_v31  ;;  %v1338_v31 = vunpack.c.l.bf16 %v1312_v19 }
 0x2ab   : > { %v3125_v37 = vunpack.c.l.bf16 %v1328_v33  ;;  %v3127_v38 = vunpack.c.h.bf16 %v1328_v33  ;;  %v1288_v44 = vmax.f32 %v1284_v39, 0.0 }
 0x2ad   : > { %v1362_v40 = vmul.f32 %v1346_v34, %v3125_v37  ;;  %v1363_v41 = vmul.f32 %v1347_v35, %v3127_v38  ;;  %v1360_v51 = vmul.f32 %v1344_v42, %v3125_v37  ;;  %v1361_v52 = vmul.f32 %v1345_v43, %v3127_v38 }
 0x2ae   : > { %v1372_v53 = vpack.c.bf16 %v1288_v44, %v1288_v44  ;;  %v1358_v3 = vmul.f32 %v1342_v57, %v3125_v37  ;;  %v1359_v6 = vmul.f32 %v1343_v58, %v3127_v38  ;;  %v1356_v21 = vmul.f32 %v1340_v11, %v3125_v37 }
 0x2af   : > { %v1371_v45 = vpack.c.bf16 %v1363_v41, %v1362_v40  ;;  %v1370_v56 = vpack.c.bf16 %v1361_v52, %v1360_v51  ;;  %v1357_v24 = vmul.f32 %v1341_v15, %v3127_v38  ;;  %v1354_v36 = vmul.f32 %v1338_v31, %v3125_v37 }
 0x2b0   : > { %v1285_v46 = vpop.f32.mrf.mxu0  ;;  %v1376_v59 = vunpack.c.l.b16 %v1372_v53  ;;  %v1369_v13 = vpack.c.bf16 %v1359_v6, %v1358_v3  ;;  %v1355_v39 = vmul.f32 %v1339_v5, %v3127_v38  ;;  %v1311_v40 = vpack.c.bf16 %v3087_v8, %v3087_v8 }
 0x2b1   : > { %v1286_v49 = vadd.f32 %v2210_v30, %v1285_v46  ;;  %v1432_v50 = vsel %vm720_vm0, %v1371_v45, 0  ;;  %v1429_v2 = vsel %vm720_vm0, %v1370_v56, 0  ;;  %v1368_v30 = vpack.c.bf16 %v1357_v24, %v1356_v21 }
 0x2b2   : > { %1434 = vmatpush.bf16.xpose.msra.mxu1 %v1432_v50  ;;  %v1426_v20 = vsel %vm720_vm0, %v1369_v13, 0  ;;  %v1308_v44 = vpack.c.bf16 %v3105_v17, %v3105_v17  ;;  %v1367_v45 = vpack.c.bf16 %v1355_v39, %v1354_v36  ;;  %v1337_v47 = vunpack.c.l.bf16 %v1311_v40 }
 0x2b3   : > { %v1289_v54 = vmax.f32 %v1286_v49, 0.0  ;;  %v1423_v4 = vsel %vm720_vm0, %v1368_v30, 0  ;;  %v1306_v52 = vpack.c.bf16 %v3119_v27, %v3119_v27 }
 0x2b4   : > { %v1334_v50 = vunpack.c.l.bf16 %v1308_v44  ;;  %v1420_v17 = vsel %vm720_vm0, %v1367_v45, 0 }
 0x2b5   : > { %v1373_v55 = vpack.c.bf16 %v1289_v54, %v1289_v54  ;;  %v1307_v54 = vpack.c.bf16 %v3111_v22, %v3111_v22 }
 0x2b6   : > { %v1350_v22 = vmul.f32 %v1334_v50, %v3125_v37 }
 0x2b7   : > { %v1377_v60 = vunpack.c.l.b16 %v1373_v55  ;;  %v1333_v27 = vunpack.c.l.bf16 %v1307_v54 }
 0x2b9   : > { %v1378_v1 = vpack.c.b16 %v1377_v60, %v1376_v59  ;;  %v1332_v59 = vunpack.c.l.bf16 %v1306_v52 }
 0x2ba   : > { %1435 = vmatpush.bf16.xpose.msra.mxu1 %v1429_v2 }
 0x2bb   : > { %v3145_v7 = vunpack.c.l.bf16 %v1378_v1  ;;  %v3147_v10 = vunpack.c.h.bf16 %v1378_v1 }
 0x2bd   : > { %v1396_v12 = vmul.f32 %v3145_v7, %v1346_v34  ;;  %v1397_v0 = vmul.f32 %v3147_v10, %v1347_v35  ;;  %v1394_v16 = vmul.f32 %v3145_v7, %v1344_v42  ;;  %v1395_v18 = vmul.f32 %v3147_v10, %v1345_v43 }
 0x2be   : > { %v1392_v28 = vmul.f32 %v3145_v7, %v1342_v57  ;;  %v1393_v29 = vmul.f32 %v3147_v10, %v1343_v58  ;;  %v1390_v33 = vmul.f32 %v3145_v7, %v1340_v11  ;;  %v1391_v34 = vmul.f32 %v3147_v10, %v1341_v15 }
 0x2bf   : > { %v1405_v63 = vpack.c.bf16 %v1397_v0, %v1396_v12  ;;  %v1404_v26 = vpack.c.bf16 %v1395_v18, %v1394_v16  ;;  %v1310_v35 = vpack.c.bf16 %v3093_v9, %v3093_v9  ;;  %v1388_v42 = vmul.f32 %v3145_v7, %v1338_v31 }
 0x2c0   : > { %v1403_v32 = vpack.c.bf16 %v1393_v29, %v1392_v28  ;;  %v1402_v41 = vpack.c.bf16 %v1391_v34, %v1390_v33  ;;  %v1389_v43 = vmul.f32 %v3147_v10, %v1339_v5  ;;  %v1309_v9 = vpack.c.bf16 %v3099_v14, %v3099_v14 }
 0x2c1   : > { %1459 = vmatpush.bf16.msrb.mxu2 %v1405_v63  ;;  %v1336_v46 = vunpack.c.l.bf16 %v1310_v35  ;;  %v1387_v8 = vmul.f32 %v3147_v10, %v1337_v47  ;;  %v1353_v14 = vmul.f32 %v1337_v47, %v3127_v38  ;;  %v1384_v56 = vmul.f32 %v3145_v7, %v1334_v50 }
 0x2c2   : > { %1436 = vmatpush.bf16.xpose.msra.mxu1 %v1426_v20  ;;  %v1401_v48 = vpack.c.bf16 %v1389_v43, %v1388_v42  ;;  %v1335_v51 = vunpack.c.l.bf16 %v1309_v9  ;;  %v1382_v62 = vmul.f32 %v3145_v7, %v1332_v59  ;;  %v1383_v61 = vmul.f32 %v3147_v10, %v1333_v27  ;;  %v1558_v9 = vld [vmem:[%s2756_s14] sm:$0xff] }
 0x2c3   : > { %v1386_v49 = vmul.f32 %v3145_v7, %v1336_v46  ;;  %v1352_v53 = vmul.f32 %v1336_v46, %v3125_v37  ;;  %v1348_v12 = vmul.f32 %v1332_v59, %v3125_v37  ;;  %v1349_v0 = vmul.f32 %v1333_v27, %v3127_v38 }
 0x2c4   : > { %v1385_v57 = vmul.f32 %v3147_v10, %v1335_v51  ;;  %v1351_v2 = vmul.f32 %v1335_v51, %v3127_v38  ;;  %v1398_v3 = vpack.c.bf16 %v1383_v61, %v1382_v62 }
 0x2c5   : > { %1460 = vmatpush.bf16.msrb.mxu2 %v1404_v26  ;;  %v1400_v55 = vpack.c.bf16 %v1387_v8, %v1386_v49  ;;  %v1366_v58 = vpack.c.bf16 %v1353_v14, %v1352_v53  ;;  %v1364_v7 = vpack.c.bf16 %v1349_v0, %v1348_v12  ;;  %v1559_v49 = vld [vmem:[%s2756_s14 + $0x8] sm:$0xff]  ;;  %s2093_s14 = sshll.u32 %s2640_s30, 4  ;;  %s1598_s30 = scalar_lea.sflag [#allocation4], %s2750_s29 }
 0x2c6   : > { %v1399_v60 = vpack.c.bf16 %v1385_v57, %v1384_v56  ;;  %v1365_v6 = vpack.c.bf16 %v1351_v2, %v1350_v22  ;;  %s1609_s3 = scalar_lea.hbm %s3303_s13, %s2093_s14 }
 0x2c7   : > { %v1417_v1 = vsel %vm720_vm0, %v1366_v58, 0  ;;  %v1411_v10 = vsel %vm720_vm0, %v1364_v7, 0  ;;  %s1612_s23 = sshll.u32 %s1609_s3, 4  ;;  %s1613_s23 = int_to_ptr.hbm [resolvable:$true] %s1612_s23 }
 0x2c8   : > { %v1414_v11 = vsel %vm720_vm0, %v1365_v6, 0  ;;  %s2448_s0 = sshra.s32 %s1613_s23, 4  ;;  %s2449_s0 = int_to_ptr.hbm [resolvable:$true] %s2448_s0 }
 0x2c9   : > { %1461 = vmatpush.bf16.msrb.mxu2 %v1403_v32  ;;  %s2450_s11 = scalar_lea.hbm %s2449_s0, 16  ;;  %p2455_p7 = scmp.lt.s32.totalorder %s2449_s0, %s3303_s13 }
 0x2ca   : > { %1437 = vmatpush.bf16.xpose.msra.mxu1 %v1423_v4  ;;  %v2211_v4 = vld [vmem:[%s3302_s10] ss:$0 sm:$0xff]  ;;  %p2451_p1 = scmp.ne.s32.totalorder %s2449_s0, %s2450_s11  ;;  %p2456_p8 = scmp.lt.s32.totalorder %s2454_s28, %s2450_s11 }
 0x2cc   : > { %p2452_p5 = pnand %p2451_p1, %p2716_p4  ;;  %p2457_p9 = por %p2456_p8, %p2455_p7 }
 0x2cd   : > { %1462 = vmatpush.bf16.msrb.mxu2 %v1402_v41 }
 0x2ce   : > { %p2453_p12 = pneg %p2452_p5 }
 0x2d0   : > { %p2458_p10 = pnand %p2457_p9, %p2453_p12 }
 0x2d1   : > { %1463 = vmatpush.bf16.msrb.mxu2 %v1401_v48 }
 0x2d2   : > { %1438 = vmatpush.bf16.xpose.msra.mxu1 %v1420_v17 }
 0x2d5   : > { %1464 = vmatpush.bf16.msrb.mxu2 %v1400_v55 }
 0x2d9   : > { %1465 = vmatpush.bf16.msrb.mxu2 %v1399_v60 }
 0x2da   : > { %1439 = vmatpush.bf16.xpose.msra.mxu1 %v1417_v1 }
 0x2dd   : > { %1466 = vmatpush.bf16.msrb.mxu2 %v1398_v3 }
 0x2e2   : > { %1440 = vmatpush.bf16.xpose.msra.mxu1 %v1414_v11 }
 0x2ea   : > { %1441 = vmatpush.bf16.xpose.msra.mxu1 %v1411_v10 }
 0x2f1   : > { %2015 = vmatmul.msk.bf16.vlgmr.msra.gmra.mxu1 %vm720_vm0, %v3113_v23  ;;  %v2091_v23 = vld [vmem:[#allocation13] sm:$0xff] }
 0x2f2   : > { %1531 = vmatpush.bf16.msra.mxu0 %v2091_v23 }
 0x36e   : > { %v1443_v13 = vpop.f32.mrf.mxu1 }
 0x36f   : > { %1448 = vmax.xlane.f32.xlu0 %v1443_v13 }
 0x376   : > { %v1445_v15 = vpop.f32.mrf.mxu1 }
 0x377   : > { %1450 = vmax.xlane.f32.xlu0 %v1445_v15 }
 0x3e2   : > { %v1449_v63 = vpop.xlane.xlu0 %1448 }
 0x3e3   : > { %v1452_v16 = vsub.f32 %v1443_v13, %v1449_v63 }
 0x3e5   : > { %v1454_v18 = vmul.f32 1.442695, %v1452_v16 }
 0x3e7   : > { %2212 = vpow2.f32 %v1454_v18 }
 0x3ea   : > { %v1451_v19 = vpop.xlane.xlu0 %1450 }
 0x3eb   : > { %v1453_v37 = vsub.f32 %v1445_v15, %v1451_v19 }
 0x3ed   : > { %v2213_v20 = vpop.eup %2212  ;;  %v1456_v38 = vmul.f32 1.442695, %v1453_v37 }
 0x3ee   : > { %1489 = vmatmul.f32.vlgmr.msra.gmra.mxu3 %v2213_v20 }
 0x3ef   : > { %2214 = vpow2.f32 %v1456_v38 }
 0x3f5   : > { %v2215_v21 = vpop.eup %2214 }
 0x3f6   : > { %1492 = vmatmul.f32.gmra.mxu3 %v2215_v21  ;;  %v1458_v24 = vpack.c.bf16 %v2215_v21, %v2213_v20 }
 0x3f8   : > { %1467 = vmatmul.bf16.vlgmr.msrb.gmra.mxu2 %v1458_v24 }
 0x471   : > { %v1490_v26 = vpop.f32.mrf.mxu3 }
 0x472   : > { %2216 = vrcp.f32 %v1490_v26 }
 0x478   : > { %v2217_v30 = vpop.eup %2216 }
 0x479   : > { %v1493_v28 = vpop.f32.mrf.mxu3 }
 0x47a   : > { %2218 = vrcp.f32 %v1493_v28 }
 0x47b   : > { %v1468_v29 = vpop.f32.mrf.mxu2 }
 0x47c   : > { %v1498_v32 = vmul.f32 %v2217_v30, %v1468_v29 }
 0x480   : > { %v2219_v31 = vpop.eup %2218 }
 0x483   : > { %v1470_v5 = vpop.f32.mrf.mxu2 }
 0x484   : > { %v1499_v33 = vmul.f32 %v2219_v31, %v1470_v5 }
 0x486   : > { %v1500_v34 = vpack.c.bf16 %v1499_v33, %v1498_v32 }
 0x488   : > { %2024 = vmatmul.msk.bf16.vlgmr.msra.gmra.mxu0 %vm720_vm0, %v1500_v34 }
 0x505   : > { %v1533_v35 = vpop.f32.mrf.mxu0 }
 0x506   : > { %v1534_v36 = vadd.f32 %v2211_v4, %v1533_v35 }
 0x508   : > { %v1538_v41 = vmax.f32 %v1534_v36, 0.0 }
 0x50d   : > { %v1535_v39 = vpop.f32.mrf.mxu0 }
 0x50e   : > { %v1536_v40 = vadd.f32 %v2211_v4, %v1535_v39 }
 0x510   : > { %v1539_v42 = vmax.f32 %v1536_v40, 0.0 }
 0x512   : > { %v1540_v43 = vpack.c.bf16 %v1539_v42, %v1538_v41 }
 0x514   : > { %v1542_v44 = vsel %vm720_vm0, %v1540_v43, 0 }
 0x515   : > { %1551 = vmatpush.bf16.xpose.msrb.mxu0 %v1542_v44 }
 0x51c   : > { %2025 = vmatmul.msk.bf16.vlgmr.msrb.gmra.mxu0 %vm720_vm0, %v1540_v43 }
 0x599   : > { %v1553_v45 = vpop.f32.mrf.mxu0 }
 0x59a   : > { %v1560_v46 = vmul.f32 %v1558_v9, %v1553_v45 }
 0x59c   : > { %v1562_v47 = vmul.f32 %v1560_v46, %v1560_v46 }
 0x59e   : > { %v1565_v48 = vsel %vm1564_vm1, %v1562_v47, 0.0 }
 0x59f   : > { %1566 = vadd.xlane.f32.xlu1 %v1565_v48 }
 0x5a1   : > { %v1555_v8 = vpop.f32.mrf.mxu0 }
 0x5a2   : > { %v1561_v50 = vmul.f32 %v1559_v49, %v1555_v8 }
 0x5a4   : > { %v1563_v51 = vmul.f32 %v1561_v50, %v1561_v50 }
 0x5a6   : > { %v1568_v52 = vsel %vm1564_vm1, %v1563_v51, 0.0 }
 0x5a7   : > { %1569 = vadd.xlane.f32.xlu1 %v1568_v52 }
 0x612   : > { %v1567_v17 = vpop.xlane.xlu1 %1566 }
 0x613   : > { %v1571_v53 = vmax.f32 %v1567_v17, 1e-24 }
 0x615   : > { %2220 = vrsqrt.f32 %v1571_v53  ;;  %vm1579_vm3 = vweird.f32 %v1571_v53 }
 0x61a   : > { %v1570_v14 = vpop.xlane.xlu1 %1569 }
 0x61b   : > { %v2221_v54 = vpop.eup %2220  ;;  %v1572_v55 = vmax.f32 %v1570_v14, 1e-24 }
 0x61c   : > { %v1574_v56 = vmul.f32 %v2221_v54, %v1571_v53  ;;  %vm1580_vm2 = vweird.f32 %v2221_v54 }
 0x61d   : > { %2222 = vrsqrt.f32 %v1572_v55  ;;  %vm1581_vm4 = vmor %vm1579_vm3, %vm1580_vm2  ;;  %vm1589_vm6 = vweird.f32 %v1572_v55 }
 0x61e   : > { %v1575_v57 = vmul.f32 %v2221_v54, %v1574_v56 }
 0x620   : > { %v1576_v58 = vmul.f32 0.5, %v1575_v57 }
 0x622   : > { %v1577_v59 = vsub.f32 1.5, %v1576_v58 }
 0x623   : > { %v2223_v27 = vpop.eup %2222 }
 0x624   : > { %v1578_v60 = vmul.f32 %v2221_v54, %v1577_v59  ;;  %v1584_v62 = vmul.f32 %v2223_v27, %v1572_v55  ;;  %vm1590_vm5 = vweird.f32 %v2223_v27 }
 0x625   : > { %vm1591_vm7 = vmor %vm1589_vm6, %vm1590_vm5 }
 0x626   : > { %v1582_v61 = vsel %vm1581_vm4, %v2221_v54, %v1578_v60  ;;  %v1585_v1 = vmul.f32 %v2223_v27, %v1584_v62 }
 0x627   : > { %v1593_v22 = vmul.f32 %v1582_v61, %v1560_v46 }
 0x628   : > { %v1586_v2 = vmul.f32 0.5, %v1585_v1 }
 0x629   : > { %1595 = vst.msk [vmem:[%s680_s6] sm:$0xff] %vm1564_vm1, %v1593_v22 }
 0x62a   : > { %v1587_v3 = vsub.f32 1.5, %v1586_v2 }
 0x62c   : > { %v1588_v6 = vmul.f32 %v2223_v27, %v1587_v3 }
 0x62e   : > { %v1592_v11 = vsel %vm1591_vm7, %v2223_v27, %v1588_v6 }
 0x62f   : > { %v1594_v12 = vmul.f32 %v1592_v11, %v1561_v50 }
 0x631   : > { %1596 = vst.msk [vmem:[%s680_s6 + $0x8] sm:$0xff] %vm1564_vm1, %v1594_v12 }
 0x632   : > { %2461 = shalt.err (!%p2458_p10)
}
 0x633   : > { %s2524_s29 = smov 128   ;;  %s2525_s20 = smov 8  }
 0x634   : > { %2120 = dma.vmem_to_hbm [thread:$0]  (%p2716_p4), %s1611_s18, 256, %s1613_s23, %s1598_s30, %s2524_s29, %s2524_s29, %s2525_s20  }
 0x635 PF: > { %s1627_s22 = sand.u32 1, %s2500_s24   ;;  %p3304_p13 = scmp.ge.s32.totalorder %s2512_s27, 2 }
 0x636   : > { %s1628_s3 = scalar_lea.sflag [#allocation4], %s1627_s22 }
 0x637   : > { %p2146_p11 = pnand %p3304_p13, %p2720_p6 }
 0x639   : > { %p2147_p0 = pneg %p2146_p11 }
 0x63b   : > { %2495 = dma.done.wait (%p2147_p0), %s1628_s3, 256  }
 0x63c   : > { %2497 = vsyncadd (%p2147_p0), %s1628_s3, 4294967040  ;;  %p33_p2 = scmp.ge.s32.totalorder %s2690_s1, 4   ;;  %s3305_s24 = smov %s2504_s25 }
 0x63d   : > { %s3306_s25 = smov %s2508_s26  ;;  %s3307_s26 = smov %s2701_s9 }
 0x63e   : > { %s3308_s27 = smov %s2690_s1  ;;  %35 = sbr.rel (!%p33_p2) target bundleno = 22 (0x16), region = 160 }
 0x643   :  { %1634 = vsyncpa [#allocation3], 1 }
 0x644   :  { %1636 = vsyncpa [#allocation3 + $0x1], 1 }
 0x645   :  { %1637 = vsyncpa [#allocation6], 1 }
 0x646   :  { %1638 = vsyncpa [#allocation9], 1 }
 0x647   :  { %1639 = vsyncpa [#allocation12], 1 }
 0x648   :  { %1640 = vsyncpa [#allocation4], 1 }
 0x649   :  { %1642 = vsyncpa [#allocation4 + $0x1], 1 }

</bundles_post_ra>
